<compile_context>
chip_gen: v7x
topology: tpu7x:2x2x1
jax: 0.10.0
libtpu: 0.0.40
codegen_flags: <defaults>
</compile_context>

<pallas_src>
import functools
import numpy as np
import jax
import jax.numpy as jnp
from jax.experimental import pallas as pl
from jax.experimental.pallas import tpu as pltpu


def _round_up(v, m):
    return (v + m - 1) // m * m


# --------------------------- fused SegNetDown3 kernel ------------------------

def _segnet_down3_kernel(x_ref, w1_ref, w23_ref, sc_ref, bi_ref,
                         mask_ref, sel_ref, base_ref,
                         conv_ref, pool_ref, idx_ref,
                         patch_ref, *, H, W, Cin_p, Cout_p):
    """One batch element per grid step.

    x_ref    : (1, Cin_p, H*W)        input, channels zero-padded to mult of 8
    w1_ref   : (Cout_p, 9*Cin_p)      layer-1 weights, [co, t*Cin_p + ci]
    w23_ref  : (2, Cout_p, 9*Cout_p)  layer-2/3 weights
    sc_ref   : (3, Cout_p, 1)         folded BN scale per layer
    bi_ref   : (3, Cout_p, 1)         folded BN bias (incl. conv bias) per layer
    mask_ref : (9, 1, H*W)            SAME-padding validity mask per 3x3 tap
    sel_ref  : (4, H*W, Ho*Wo)        0/1 selection matrices for pool window
    base_ref : (1, Ho*Wo)             flat H*W index of each pool window anchor
    conv_ref : (1, Cout_p, H*W)       conv3 output
    pool_ref : (1, Cout_p, Ho*Wo)     pooled max values
    idx_ref  : (1, Cout_p, Ho*Wo)     argmax indices (PyTorch flat-H*W indices)
    patch_ref: VMEM (9*max(Cin_p,Cout_p), H*W) im2col scratch
    """

    def conv_bn_relu(cur, wmat, scale, bias, cp):
        # im2col: 9 shifted+masked copies of `cur`, stacked along sublanes.
        for t in range(9):
            dy, dx = t // 3 - 1, t % 3 - 1
            shift = dy * W + dx
            shifted = cur if shift == 0 else jnp.roll(cur, -shift, axis=1)
            patch_ref[t * cp:(t + 1) * cp, :] = shifted * mask_ref[t]
        patches = patch_ref[0:9 * cp, :]
        acc = jnp.dot(wmat, patches, preferred_element_type=jnp.float32)
        return jnp.maximum(acc * scale + bias, 0.0)           # BN + ReLU

    x = x_ref[0]                                              # (Cin_p, H*W)
    y = conv_bn_relu(x, w1_ref[...], sc_ref[0], bi_ref[0], Cin_p)
    y = conv_bn_relu(y, w23_ref[0], sc_ref[1], bi_ref[1], Cout_p)
    y = conv_bn_relu(y, w23_ref[1], sc_ref[2], bi_ref[2], Cout_p)
    conv_ref[0] = y.astype(conv_ref.dtype)

    # ---- 2x2 maxpool with argmax; window elems gathered via selection matmuls
    a = jnp.dot(y, sel_ref[0], preferred_element_type=jnp.float32)
    b = jnp.dot(y, sel_ref[1], preferred_element_type=jnp.float32)
    c = jnp.dot(y, sel_ref[2], preferred_element_type=jnp.float32)
    d = jnp.dot(y, sel_ref[3], preferred_element_type=jnp.float32)
    m = a
    off = jnp.zeros(m.shape, jnp.int32)                       # offset in window
    upd = b > m                                               # '>' => first max wins
    m, off = jnp.where(upd, b, m), jnp.where(upd, 1, off)
    upd = c > m
    m, off = jnp.where(upd, c, m), jnp.where(upd, W, off)
    upd = d > m
    m, off = jnp.where(upd, d, m), jnp.where(upd, W + 1, off)
    pool_ref[0] = m.astype(pool_ref.dtype)
    idx_ref[0] = off + base_ref[...]                          # flat H*W index


# ------------------------------ host-side packing -----------------------------

def _pack_for_kernel(folded, Cin, H, W):
    """Pad channels to multiples of 8 and pack weights / constants for the kernel."""
    (w9_1, s1, b1), (w9_2, s2, b2), (w9_3, s3, b3) = folded
    Cout = w9_1.shape[-1]
    Cin_p, Cout_p = _round_up(Cin, 8), _round_up(Cout, 8)
    Ho, Wo = H // 2, W // 2

    def pack_w(w9, cin, cin_p):
        w = jnp.transpose(w9, (2, 0, 1))                      # (Cout, 9, cin)
        w = jnp.pad(w, ((0, Cout_p - Cout), (0, 0), (0, cin_p - cin)))
        return w.reshape(Cout_p, 9 * cin_p)

    def pack_v(v):
        return jnp.pad(v, (0, Cout_p - Cout)).reshape(Cout_p, 1)

    w1 = pack_w(w9_1, Cin, Cin_p)
    w23 = jnp.stack([pack_w(w9_2, Cout, Cout_p), pack_w(w9_3, Cout, Cout_p)])
    scales = jnp.stack([pack_v(s1), pack_v(s2), pack_v(s3)])
    biases = jnp.stack([pack_v(b1), pack_v(b2), pack_v(b3)])

    # SAME-padding tap masks (valid 2D coords) in the flat y*W+x layout.
    ys, xs = np.meshgrid(np.arange(H), np.arange(W), indexing="ij")
    masks = np.zeros((9, 1, H * W), np.float32)
    for t in range(9):
        dy, dx = t // 3 - 1, t % 3 - 1
        valid = (ys + dy >= 0) & (ys + dy < H) & (xs + dx >= 0) & (xs + dx < W)
        masks[t, 0] = valid.reshape(-1).astype(np.float32)

    # Pooling window selection matrices + anchor indices.
    sel = np.zeros((4, H * W, Ho * Wo), np.float32)
    base = np.zeros((1, Ho * Wo), np.int32)
    for yo in range(Ho):
        for xo in range(Wo):
            j = yo * Wo + xo
            anchor = 2 * yo * W + 2 * xo
            base[0, j] = anchor
            for k, off in enumerate((0, 1, W, W + 1)):
                sel[k, anchor + off, j] = 1.0

    return dict(w1=w1, w23=w23, scales=scales, biases=biases,
                masks=jnp.asarray(masks), sel=jnp.asarray(sel),
                base=jnp.asarray(base), Cin_p=Cin_p, Cout_p=Cout_p, Cout=Cout)


# ------------------------------- SegNetDown3 ---------------------------------

def init_segnet_down3_params(key, in_size, out_size, n_layers=3):
    """Deterministic parameter init. Returns raw per-layer params."""
    raw = []
    cin = in_size
    for _ in range(n_layers):
        key, kw, kb, kg, kbe, km, kv = jax.random.split(key, 7)
        w = jax.random.normal(kw, (3, 3, cin, out_size), jnp.float32) * 0.1   # HWIO
        b = jax.random.normal(kb, (out_size,), jnp.float32) * 0.1
        gamma = 1.0 + 0.1 * jax.random.normal(kg, (out_size,), jnp.float32)
        beta = 0.1 * jax.random.normal(kbe, (out_size,), jnp.float32)
        mean = 0.1 * jax.random.normal(km, (out_size,), jnp.float32)
        var = 1.0 + 0.1 * jnp.abs(jax.random.normal(kv, (out_size,), jnp.float32))
        raw.append((w, b, gamma, beta, mean, var))
        cin = out_size
    return raw


def fold_params(raw):
    """Fold conv bias + BN (eval mode) into (w9, scale, bias) per layer."""
    eps = 1e-5
    folded = []
    for (w, b, gamma, beta, mean, var) in raw:
        kh, kw, cin, cout = w.shape
        w9 = w.reshape(kh * kw, cin, cout)
        scale = gamma / jnp.sqrt(var + eps)
        bias = (b - mean) * scale + beta
        folded.append((w9, scale, bias))
    return folded


def segnet_down3_forward(x_nchw, folded_params, skip_maxpool=False):
    N, Cin, H, W = x_nchw.shape
    assert H % 2 == 0 and W % 2 == 0, "SegNet 2x2 pooling needs even spatial dims"
    pk = _pack_for_kernel(folded_params, Cin, H, W)
    Cin_p, Cout_p, Cout = pk["Cin_p"], pk["Cout_p"], pk["Cout"]
    HW, Ho, Wo = H * W, H // 2, W // 2

    x = x_nchw.reshape(N, Cin, HW)                            # free (contiguous)
    if Cin_p != Cin:
        x = jnp.pad(x, ((0, 0), (0, Cin_p - Cin), (0, 0)))    # tiny one-time pad

    kernel = functools.partial(_segnet_down3_kernel, H=H, W=W,
                               Cin_p=Cin_p, Cout_p=Cout_p)
    whole = lambda shape: pl.BlockSpec(shape, lambda n, _s=shape: (0,) * len(_s))

    conv_f, pool_f, idx_f = pl.pallas_call(
        kernel,
        out_shape=(jax.ShapeDtypeStruct((N, Cout_p, HW), jnp.float32),
                   jax.ShapeDtypeStruct((N, Cout_p, Ho * Wo), jnp.float32),
                   jax.ShapeDtypeStruct((N, Cout_p, Ho * Wo), jnp.int32)),
        grid=(N,),
        in_specs=[
            pl.BlockSpec((1, Cin_p, HW), lambda n: (n, 0, 0)),
            whole((Cout_p, 9 * Cin_p)),
            whole((2, Cout_p, 9 * Cout_p)),
            whole((3, Cout_p, 1)),
            whole((3, Cout_p, 1)),
            whole((9, 1, HW)),
            whole((4, HW, Ho * Wo)),
            whole((1, Ho * Wo)),
        ],
        out_specs=(pl.BlockSpec((1, Cout_p, HW), lambda n: (n, 0, 0)),
                   pl.BlockSpec((1, Cout_p, Ho * Wo), lambda n: (n, 0, 0)),
                   pl.BlockSpec((1, Cout_p, Ho * Wo), lambda n: (n, 0, 0))),
        scratch_shapes=[pltpu.VMEM((9 * max(Cin_p, Cout_p), HW), jnp.float32)],
        compiler_params=pltpu.CompilerParams(
            dimension_semantics=("parallel",)),
    )(x, pk["w1"], pk["w23"], pk["scales"], pk["biases"],
      pk["masks"], pk["sel"], pk["base"])

    conv_out = conv_f[:, :Cout, :].reshape(N, Cout, H, W)
    pooled = pool_f[:, :Cout, :].reshape(N, Cout, Ho, Wo)
    indices = idx_f[:, :Cout, :].reshape(N, Cout, Ho, Wo)
    unpooled_shape = (N, Cout, H, W)
    if skip_maxpool:
        return conv_out, indices, unpooled_shape
    return pooled, indices, unpooled_shape


# --------------------------------- reference ---------------------------------

def _reference(x_nchw, raw):
    eps = 1e-5
    x = x_nchw
    for (w, b, gamma, beta, mean, var) in raw:
        y = jax.lax.conv_general_dilated(
            x, w, (1, 1), "SAME",
            dimension_numbers=("NCHW", "HWIO", "NCHW"))
        y = y + b[None, :, None, None]
        y = (y - mean[None, :, None, None]) / jnp.sqrt(var + eps)[None, :, None, None]
        y = y * gamma[None, :, None, None] + beta[None, :, None, None]
        x = jnp.maximum(y, 0.0)
    pooled = jax.lax.reduce_window(x, -jnp.inf, jax.lax.max,
                                   (1, 1, 2, 2), (1, 1, 2, 2), "VALID")
    return x, pooled


# ------------------------------------ main ------------------------------------

if __name__ == "__main__":
    key = jax.random.PRNGKey(0)
    key, kx = jax.random.split(key)
    N, Cin, Cout, H, W = 2, 4, 8, 16, 16
    x = jax.random.normal(kx, (N, Cin, H, W), jnp.float32)

    raw = init_segnet_down3_params(key, Cin, Cout)
    folded = fold_params(raw)

    pooled, indices, unpooled_shape = segnet_down3_forward(x, folded)
    pooled = jax.block_until_ready(pooled)
    indices = jax.block_until_ready(indices)

    # sanity-check against a pure-JAX reference
    conv_ref, pooled_ref = _reference(x, raw)
    np.testing.assert_allclose(np.asarray(pooled), np.asarray(pooled_ref),
                               atol=1e-4, rtol=1e-4)
    # indices must point at the max value within each (n, c) plane
    conv_ref_np = np.asarray(conv_ref)
    idx_np = np.asarray(indices)
    gathered = np.take_along_axis(
        conv_ref_np.reshape(N, Cout, H * W), idx_np.reshape(N, Cout, -1), axis=-1
    ).reshape(idx_np.shape)
    np.testing.assert_allclose(gathered, np.asarray(pooled), atol=1e-4, rtol=1e-4)

    # skip_maxpool path returns the conv3 output
    conv_out, _, _ = segnet_down3_forward(x, folded, skip_maxpool=True)
    conv_out = jax.block_until_ready(conv_out)
    np.testing.assert_allclose(np.asarray(conv_out), conv_ref_np,
                               atol=1e-4, rtol=1e-4)

    assert unpooled_shape == (N, Cout, H, W)
    print("KERNEL_OK")
</pallas_src>

<mosaic_0001>
module attributes {stable_mosaic.version = 11 : i64} {
  func.func @_segnet_down3_kernel(%arg0: i32, %arg1: memref<1x8x256xf32, #tpu.memory_space<vmem>>, %arg2: memref<8x72xf32, #tpu.memory_space<vmem>>, %arg3: memref<2x8x72xf32, #tpu.memory_space<vmem>>, %arg4: memref<3x8x1xf32, #tpu.memory_space<vmem>>, %arg5: memref<3x8x1xf32, #tpu.memory_space<vmem>>, %arg6: memref<9x1x256xf32, #tpu.memory_space<vmem>>, %arg7: memref<4x256x64xf32, #tpu.memory_space<vmem>>, %arg8: memref<1x64xi32, #tpu.memory_space<vmem>>, %arg9: memref<1x8x256xf32, #tpu.memory_space<vmem>>, %arg10: memref<1x8x64xf32, #tpu.memory_space<vmem>>, %arg11: memref<1x8x64xi32, #tpu.memory_space<vmem>>, %arg12: memref<72x256xf32, #tpu.memory_space<vmem>>) attributes {dimension_semantics = [#tpu.dimension_semantics<parallel>], iteration_bounds = array<i64: 2>, scalar_prefetch = 0 : i64, scratch_operands = 1 : i64, tpu.core_type = #tpu.core_type<tc>, window_params = [{transform_indices = @transform_0, window_bounds = array<i64: 1, 8, 256>}, {pipeline_mode = #tpu.pipeline_mode<synchronous>, transform_indices = @transform_1, window_bounds = array<i64: 8, 72>}, {pipeline_mode = #tpu.pipeline_mode<synchronous>, transform_indices = @transform_2, window_bounds = array<i64: 2, 8, 72>}, {pipeline_mode = #tpu.pipeline_mode<synchronous>, transform_indices = @transform_3, window_bounds = array<i64: 3, 8, 1>}, {pipeline_mode = #tpu.pipeline_mode<synchronous>, transform_indices = @transform_4, window_bounds = array<i64: 3, 8, 1>}, {pipeline_mode = #tpu.pipeline_mode<synchronous>, transform_indices = @transform_5, window_bounds = array<i64: 9, 1, 256>}, {pipeline_mode = #tpu.pipeline_mode<synchronous>, transform_indices = @transform_6, window_bounds = array<i64: 4, 256, 64>}, {pipeline_mode = #tpu.pipeline_mode<synchronous>, transform_indices = @transform_7, window_bounds = array<i64: 1, 64>}, {transform_indices = @transform_8, window_bounds = array<i64: 1, 8, 256>}, {transform_indices = @transform_9, window_bounds = array<i64: 1, 8, 64>}, {transform_indices = @transform_10, window_bounds = array<i64: 1, 8, 64>}]} {
    %c0 = arith.constant 0 : index
    %c0_0 = arith.constant 0 : index
    %c0_1 = arith.constant 0 : index
    %0 = vector.load %arg1[%c0, %c0_0, %c0_1] : memref<1x8x256xf32, #tpu.memory_space<vmem>>, vector<1x8x256xf32>
    %1 = vector.shape_cast %0 : vector<1x8x256xf32> to vector<8x256xf32>
    %c0_2 = arith.constant 0 : index
    %c0_3 = arith.constant 0 : index
    %2 = vector.load %arg2[%c0_2, %c0_3] : memref<8x72xf32, #tpu.memory_space<vmem>>, vector<8x72xf32>
    %c0_4 = arith.constant 0 : index
    %c0_5 = arith.constant 0 : index
    %c0_6 = arith.constant 0 : index
    %3 = vector.load %arg4[%c0_4, %c0_5, %c0_6] : memref<3x8x1xf32, #tpu.memory_space<vmem>>, vector<1x8x1xf32>
    %4 = vector.shape_cast %3 : vector<1x8x1xf32> to vector<8x1xf32>
    %c0_7 = arith.constant 0 : index
    %c0_8 = arith.constant 0 : index
    %c0_9 = arith.constant 0 : index
    %5 = vector.load %arg5[%c0_7, %c0_8, %c0_9] : memref<3x8x1xf32, #tpu.memory_space<vmem>>, vector<1x8x1xf32>
    %6 = vector.shape_cast %5 : vector<1x8x1xf32> to vector<8x1xf32>
    %7 = vector.extract_strided_slice %1 {offsets = [0, 239], sizes = [8, 17], strides = [1, 1]} : vector<8x256xf32> to vector<8x17xf32>
    %8 = vector.extract_strided_slice %1 {offsets = [0, 0], sizes = [8, 239], strides = [1, 1]} : vector<8x256xf32> to vector<8x239xf32>
    %9 = tpu.concatenate %7, %8 in 1 : vector<8x17xf32>, vector<8x239xf32> -> vector<8x256xf32>
    %c0_10 = arith.constant 0 : index
    %c0_11 = arith.constant 0 : index
    %c0_12 = arith.constant 0 : index
    %10 = vector.load %arg6[%c0_10, %c0_11, %c0_12] : memref<9x1x256xf32, #tpu.memory_space<vmem>>, vector<1x1x256xf32>
    %11 = vector.shape_cast %10 : vector<1x1x256xf32> to vector<1x256xf32>
    %12 = vector.broadcast %11 : vector<1x256xf32> to vector<8x256xf32>
    %13 = arith.mulf %9, %12 : vector<8x256xf32>
    %c0_13 = arith.constant 0 : index
    %c0_14 = arith.constant 0 : index
    %14 = vector.load %arg12[%c0_13, %c0_14] : memref<72x256xf32, #tpu.memory_space<vmem>>, vector<8x256xf32>
    tpu.vector_store %arg12[%c0_13, %c0_14], %13 {strides = array<i32>} : memref<72x256xf32, #tpu.memory_space<vmem>>, vector<8x256xf32>,
    %15 = vector.extract_strided_slice %1 {offsets = [0, 240], sizes = [8, 16], strides = [1, 1]} : vector<8x256xf32> to vector<8x16xf32>
    %16 = vector.extract_strided_slice %1 {offsets = [0, 0], sizes = [8, 240], strides = [1, 1]} : vector<8x256xf32> to vector<8x240xf32>
    %17 = tpu.concatenate %15, %16 in 1 : vector<8x16xf32>, vector<8x240xf32> -> vector<8x256xf32>
    %c1 = arith.constant 1 : index
    %c0_15 = arith.constant 0 : index
    %c0_16 = arith.constant 0 : index
    %18 = vector.load %arg6[%c1, %c0_15, %c0_16] : memref<9x1x256xf32, #tpu.memory_space<vmem>>, vector<1x1x256xf32>
    %19 = vector.shape_cast %18 : vector<1x1x256xf32> to vector<1x256xf32>
    %20 = vector.broadcast %19 : vector<1x256xf32> to vector<8x256xf32>
    %21 = arith.mulf %17, %20 : vector<8x256xf32>
    %c8 = arith.constant 8 : index
    %c0_17 = arith.constant 0 : index
    %22 = vector.load %arg12[%c8, %c0_17] : memref<72x256xf32, #tpu.memory_space<vmem>>, vector<8x256xf32>
    tpu.vector_store %arg12[%c8, %c0_17], %21 {strides = array<i32>} : memref<72x256xf32, #tpu.memory_space<vmem>>, vector<8x256xf32>,
    %23 = vector.extract_strided_slice %1 {offsets = [0, 241], sizes = [8, 15], strides = [1, 1]} : vector<8x256xf32> to vector<8x15xf32>
    %24 = vector.extract_strided_slice %1 {offsets = [0, 0], sizes = [8, 241], strides = [1, 1]} : vector<8x256xf32> to vector<8x241xf32>
    %25 = tpu.concatenate %23, %24 in 1 : vector<8x15xf32>, vector<8x241xf32> -> vector<8x256xf32>
    %c2 = arith.constant 2 : index
    %c0_18 = arith.constant 0 : index
    %c0_19 = arith.constant 0 : index
    %26 = vector.load %arg6[%c2, %c0_18, %c0_19] : memref<9x1x256xf32, #tpu.memory_space<vmem>>, vector<1x1x256xf32>
    %27 = vector.shape_cast %26 : vector<1x1x256xf32> to vector<1x256xf32>
    %28 = vector.broadcast %27 : vector<1x256xf32> to vector<8x256xf32>
    %29 = arith.mulf %25, %28 : vector<8x256xf32>
    %c16 = arith.constant 16 : index
    %c0_20 = arith.constant 0 : index
    %30 = vector.load %arg12[%c16, %c0_20] : memref<72x256xf32, #tpu.memory_space<vmem>>, vector<8x256xf32>
    tpu.vector_store %arg12[%c16, %c0_20], %29 {strides = array<i32>} : memref<72x256xf32, #tpu.memory_space<vmem>>, vector<8x256xf32>,
    %31 = vector.extract_strided_slice %1 {offsets = [0, 255], sizes = [8, 1], strides = [1, 1]} : vector<8x256xf32> to vector<8x1xf32>
    %32 = vector.extract_strided_slice %1 {offsets = [0, 0], sizes = [8, 255], strides = [1, 1]} : vector<8x256xf32> to vector<8x255xf32>
    %33 = tpu.concatenate %31, %32 in 1 : vector<8x1xf32>, vector<8x255xf32> -> vector<8x256xf32>
    %c3 = arith.constant 3 : index
    %c0_21 = arith.constant 0 : index
    %c0_22 = arith.constant 0 : index
    %34 = vector.load %arg6[%c3, %c0_21, %c0_22] : memref<9x1x256xf32, #tpu.memory_space<vmem>>, vector<1x1x256xf32>
    %35 = vector.shape_cast %34 : vector<1x1x256xf32> to vector<1x256xf32>
    %36 = vector.broadcast %35 : vector<1x256xf32> to vector<8x256xf32>
    %37 = arith.mulf %33, %36 : vector<8x256xf32>
    %c24 = arith.constant 24 : index
    %c0_23 = arith.constant 0 : index
    %38 = vector.load %arg12[%c24, %c0_23] : memref<72x256xf32, #tpu.memory_space<vmem>>, vector<8x256xf32>
    tpu.vector_store %arg12[%c24, %c0_23], %37 {strides = array<i32>} : memref<72x256xf32, #tpu.memory_space<vmem>>, vector<8x256xf32>,
    %c4 = arith.constant 4 : index
    %c0_24 = arith.constant 0 : index
    %c0_25 = arith.constant 0 : index
    %39 = vector.load %arg6[%c4, %c0_24, %c0_25] : memref<9x1x256xf32, #tpu.memory_space<vmem>>, vector<1x1x256xf32>
    %40 = vector.shape_cast %39 : vector<1x1x256xf32> to vector<1x256xf32>
    %41 = vector.broadcast %40 : vector<1x256xf32> to vector<8x256xf32>
    %42 = arith.mulf %1, %41 : vector<8x256xf32>
    %c32 = arith.constant 32 : index
    %c0_26 = arith.constant 0 : index
    %43 = vector.load %arg12[%c32, %c0_26] : memref<72x256xf32, #tpu.memory_space<vmem>>, vector<8x256xf32>
    tpu.vector_store %arg12[%c32, %c0_26], %42 {strides = array<i32>} : memref<72x256xf32, #tpu.memory_space<vmem>>, vector<8x256xf32>,
    %44 = vector.extract_strided_slice %1 {offsets = [0, 1], sizes = [8, 255], strides = [1, 1]} : vector<8x256xf32> to vector<8x255xf32>
    %45 = vector.extract_strided_slice %1 {offsets = [0, 0], sizes = [8, 1], strides = [1, 1]} : vector<8x256xf32> to vector<8x1xf32>
    %46 = tpu.concatenate %44, %45 in 1 : vector<8x255xf32>, vector<8x1xf32> -> vector<8x256xf32>
    %c5 = arith.constant 5 : index
    %c0_27 = arith.constant 0 : index
    %c0_28 = arith.constant 0 : index
    %47 = vector.load %arg6[%c5, %c0_27, %c0_28] : memref<9x1x256xf32, #tpu.memory_space<vmem>>, vector<1x1x256xf32>
    %48 = vector.shape_cast %47 : vector<1x1x256xf32> to vector<1x256xf32>
    %49 = vector.broadcast %48 : vector<1x256xf32> to vector<8x256xf32>
    %50 = arith.mulf %46, %49 : vector<8x256xf32>
    %c40 = arith.constant 40 : index
    %c0_29 = arith.constant 0 : index
    %51 = vector.load %arg12[%c40, %c0_29] : memref<72x256xf32, #tpu.memory_space<vmem>>, vector<8x256xf32>
    tpu.vector_store %arg12[%c40, %c0_29], %50 {strides = array<i32>} : memref<72x256xf32, #tpu.memory_space<vmem>>, vector<8x256xf32>,
    %52 = vector.extract_strided_slice %1 {offsets = [0, 15], sizes = [8, 241], strides = [1, 1]} : vector<8x256xf32> to vector<8x241xf32>
    %53 = vector.extract_strided_slice %1 {offsets = [0, 0], sizes = [8, 15], strides = [1, 1]} : vector<8x256xf32> to vector<8x15xf32>
    %54 = tpu.concatenate %52, %53 in 1 : vector<8x241xf32>, vector<8x15xf32> -> vector<8x256xf32>
    %c6 = arith.constant 6 : index
    %c0_30 = arith.constant 0 : index
    %c0_31 = arith.constant 0 : index
    %55 = vector.load %arg6[%c6, %c0_30, %c0_31] : memref<9x1x256xf32, #tpu.memory_space<vmem>>, vector<1x1x256xf32>
    %56 = vector.shape_cast %55 : vector<1x1x256xf32> to vector<1x256xf32>
    %57 = vector.broadcast %56 : vector<1x256xf32> to vector<8x256xf32>
    %58 = arith.mulf %54, %57 : vector<8x256xf32>
    %c48 = arith.constant 48 : index
    %c0_32 = arith.constant 0 : index
    %59 = vector.load %arg12[%c48, %c0_32] : memref<72x256xf32, #tpu.memory_space<vmem>>, vector<8x256xf32>
    tpu.vector_store %arg12[%c48, %c0_32], %58 {strides = array<i32>} : memref<72x256xf32, #tpu.memory_space<vmem>>, vector<8x256xf32>,
    %60 = vector.extract_strided_slice %1 {offsets = [0, 16], sizes = [8, 240], strides = [1, 1]} : vector<8x256xf32> to vector<8x240xf32>
    %61 = vector.extract_strided_slice %1 {offsets = [0, 0], sizes = [8, 16], strides = [1, 1]} : vector<8x256xf32> to vector<8x16xf32>
    %62 = tpu.concatenate %60, %61 in 1 : vector<8x240xf32>, vector<8x16xf32> -> vector<8x256xf32>
    %c7 = arith.constant 7 : index
    %c0_33 = arith.constant 0 : index
    %c0_34 = arith.constant 0 : index
    %63 = vector.load %arg6[%c7, %c0_33, %c0_34] : memref<9x1x256xf32, #tpu.memory_space<vmem>>, vector<1x1x256xf32>
    %64 = vector.shape_cast %63 : vector<1x1x256xf32> to vector<1x256xf32>
    %65 = vector.broadcast %64 : vector<1x256xf32> to vector<8x256xf32>
    %66 = arith.mulf %62, %65 : vector<8x256xf32>
    %c56 = arith.constant 56 : index
    %c0_35 = arith.constant 0 : index
    %67 = vector.load %arg12[%c56, %c0_35] : memref<72x256xf32, #tpu.memory_space<vmem>>, vector<8x256xf32>
    tpu.vector_store %arg12[%c56, %c0_35], %66 {strides = array<i32>} : memref<72x256xf32, #tpu.memory_space<vmem>>, vector<8x256xf32>,
    %68 = vector.extract_strided_slice %1 {offsets = [0, 17], sizes = [8, 239], strides = [1, 1]} : vector<8x256xf32> to vector<8x239xf32>
    %69 = vector.extract_strided_slice %1 {offsets = [0, 0], sizes = [8, 17], strides = [1, 1]} : vector<8x256xf32> to vector<8x17xf32>
    %70 = tpu.concatenate %68, %69 in 1 : vector<8x239xf32>, vector<8x17xf32> -> vector<8x256xf32>
    %c8_36 = arith.constant 8 : index
    %c0_37 = arith.constant 0 : index
    %c0_38 = arith.constant 0 : index
    %71 = vector.load %arg6[%c8_36, %c0_37, %c0_38] : memref<9x1x256xf32, #tpu.memory_space<vmem>>, vector<1x1x256xf32>
    %72 = vector.shape_cast %71 : vector<1x1x256xf32> to vector<1x256xf32>
    %73 = vector.broadcast %72 : vector<1x256xf32> to vector<8x256xf32>
    %74 = arith.mulf %70, %73 : vector<8x256xf32>
    %c64 = arith.constant 64 : index
    %c0_39 = arith.constant 0 : index
    %75 = vector.load %arg12[%c64, %c0_39] : memref<72x256xf32, #tpu.memory_space<vmem>>, vector<8x256xf32>
    tpu.vector_store %arg12[%c64, %c0_39], %74 {strides = array<i32>} : memref<72x256xf32, #tpu.memory_space<vmem>>, vector<8x256xf32>,
    %c0_40 = arith.constant 0 : index
    %c0_41 = arith.constant 0 : index
    %76 = vector.load %arg12[%c0_40, %c0_41] : memref<72x256xf32, #tpu.memory_space<vmem>>, vector<72x256xf32>
    %cst = arith.constant dense<0.000000e+00> : vector<8x256xf32>
    %77 = tpu.matmul %2, %76, %cst {dimension_numbers = #tpu.dot_dimension_numbers<[1], [0], [0], [1], [0, 0, 1, 1], [], []>} : vector<8x72xf32>, vector<72x256xf32>, vector<8x256xf32> -> vector<8x256xf32>
    %78 = vector.broadcast %4 : vector<8x1xf32> to vector<8x256xf32>
    %79 = arith.mulf %77, %78 : vector<8x256xf32>
    %80 = vector.broadcast %6 : vector<8x1xf32> to vector<8x256xf32>
    %81 = arith.addf %79, %80 : vector<8x256xf32>
    %cst_42 = arith.constant 0.000000e+00 : f32
    %82 = vector.broadcast %cst_42 : f32 to vector<8x256xf32>
    %83 = arith.maximumf %81, %82 : vector<8x256xf32>
    %c0_43 = arith.constant 0 : index
    %c0_44 = arith.constant 0 : index
    %c0_45 = arith.constant 0 : index
    %84 = vector.load %arg3[%c0_43, %c0_44, %c0_45] : memref<2x8x72xf32, #tpu.memory_space<vmem>>, vector<1x8x72xf32>
    %85 = vector.shape_cast %84 : vector<1x8x72xf32> to vector<8x72xf32>
    %c1_46 = arith.constant 1 : index
    %c0_47 = arith.constant 0 : index
    %c0_48 = arith.constant 0 : index
    %86 = vector.load %arg4[%c1_46, %c0_47, %c0_48] : memref<3x8x1xf32, #tpu.memory_space<vmem>>, vector<1x8x1xf32>
    %87 = vector.shape_cast %86 : vector<1x8x1xf32> to vector<8x1xf32>
    %c1_49 = arith.constant 1 : index
    %c0_50 = arith.constant 0 : index
    %c0_51 = arith.constant 0 : index
    %88 = vector.load %arg5[%c1_49, %c0_50, %c0_51] : memref<3x8x1xf32, #tpu.memory_space<vmem>>, vector<1x8x1xf32>
    %89 = vector.shape_cast %88 : vector<1x8x1xf32> to vector<8x1xf32>
    %90 = vector.extract_strided_slice %83 {offsets = [0, 239], sizes = [8, 17], strides = [1, 1]} : vector<8x256xf32> to vector<8x17xf32>
    %91 = vector.extract_strided_slice %83 {offsets = [0, 0], sizes = [8, 239], strides = [1, 1]} : vector<8x256xf32> to vector<8x239xf32>
    %92 = tpu.concatenate %90, %91 in 1 : vector<8x17xf32>, vector<8x239xf32> -> vector<8x256xf32>
    %c0_52 = arith.constant 0 : index
    %c0_53 = arith.constant 0 : index
    %c0_54 = arith.constant 0 : index
    %93 = vector.load %arg6[%c0_52, %c0_53, %c0_54] : memref<9x1x256xf32, #tpu.memory_space<vmem>>, vector<1x1x256xf32>
    %94 = vector.shape_cast %93 : vector<1x1x256xf32> to vector<1x256xf32>
    %95 = vector.broadcast %94 : vector<1x256xf32> to vector<8x256xf32>
    %96 = arith.mulf %92, %95 : vector<8x256xf32>
    %c0_55 = arith.constant 0 : index
    %c0_56 = arith.constant 0 : index
    %97 = vector.load %arg12[%c0_55, %c0_56] : memref<72x256xf32, #tpu.memory_space<vmem>>, vector<8x256xf32>
    tpu.vector_store %arg12[%c0_55, %c0_56], %96 {strides = array<i32>} : memref<72x256xf32, #tpu.memory_space<vmem>>, vector<8x256xf32>,
    %98 = vector.extract_strided_slice %83 {offsets = [0, 240], sizes = [8, 16], strides = [1, 1]} : vector<8x256xf32> to vector<8x16xf32>
    %99 = vector.extract_strided_slice %83 {offsets = [0, 0], sizes = [8, 240], strides = [1, 1]} : vector<8x256xf32> to vector<8x240xf32>
    %100 = tpu.concatenate %98, %99 in 1 : vector<8x16xf32>, vector<8x240xf32> -> vector<8x256xf32>
    %c1_57 = arith.constant 1 : index
    %c0_58 = arith.constant 0 : index
    %c0_59 = arith.constant 0 : index
    %101 = vector.load %arg6[%c1_57, %c0_58, %c0_59] : memref<9x1x256xf32, #tpu.memory_space<vmem>>, vector<1x1x256xf32>
    %102 = vector.shape_cast %101 : vector<1x1x256xf32> to vector<1x256xf32>
    %103 = vector.broadcast %102 : vector<1x256xf32> to vector<8x256xf32>
    %104 = arith.mulf %100, %103 : vector<8x256xf32>
    %c8_60 = arith.constant 8 : index
    %c0_61 = arith.constant 0 : index
    %105 = vector.load %arg12[%c8_60, %c0_61] : memref<72x256xf32, #tpu.memory_space<vmem>>, vector<8x256xf32>
    tpu.vector_store %arg12[%c8_60, %c0_61], %104 {strides = array<i32>} : memref<72x256xf32, #tpu.memory_space<vmem>>, vector<8x256xf32>,
    %106 = vector.extract_strided_slice %83 {offsets = [0, 241], sizes = [8, 15], strides = [1, 1]} : vector<8x256xf32> to vector<8x15xf32>
    %107 = vector.extract_strided_slice %83 {offsets = [0, 0], sizes = [8, 241], strides = [1, 1]} : vector<8x256xf32> to vector<8x241xf32>
    %108 = tpu.concatenate %106, %107 in 1 : vector<8x15xf32>, vector<8x241xf32> -> vector<8x256xf32>
    %c2_62 = arith.constant 2 : index
    %c0_63 = arith.constant 0 : index
    %c0_64 = arith.constant 0 : index
    %109 = vector.load %arg6[%c2_62, %c0_63, %c0_64] : memref<9x1x256xf32, #tpu.memory_space<vmem>>, vector<1x1x256xf32>
    %110 = vector.shape_cast %109 : vector<1x1x256xf32> to vector<1x256xf32>
    %111 = vector.broadcast %110 : vector<1x256xf32> to vector<8x256xf32>
    %112 = arith.mulf %108, %111 : vector<8x256xf32>
    %c16_65 = arith.constant 16 : index
    %c0_66 = arith.constant 0 : index
    %113 = vector.load %arg12[%c16_65, %c0_66] : memref<72x256xf32, #tpu.memory_space<vmem>>, vector<8x256xf32>
    tpu.vector_store %arg12[%c16_65, %c0_66], %112 {strides = array<i32>} : memref<72x256xf32, #tpu.memory_space<vmem>>, vector<8x256xf32>,
    %114 = vector.extract_strided_slice %83 {offsets = [0, 255], sizes = [8, 1], strides = [1, 1]} : vector<8x256xf32> to vector<8x1xf32>
    %115 = vector.extract_strided_slice %83 {offsets = [0, 0], sizes = [8, 255], strides = [1, 1]} : vector<8x256xf32> to vector<8x255xf32>
    %116 = tpu.concatenate %114, %115 in 1 : vector<8x1xf32>, vector<8x255xf32> -> vector<8x256xf32>
    %c3_67 = arith.constant 3 : index
    %c0_68 = arith.constant 0 : index
    %c0_69 = arith.constant 0 : index
    %117 = vector.load %arg6[%c3_67, %c0_68, %c0_69] : memref<9x1x256xf32, #tpu.memory_space<vmem>>, vector<1x1x256xf32>
    %118 = vector.shape_cast %117 : vector<1x1x256xf32> to vector<1x256xf32>
    %119 = vector.broadcast %118 : vector<1x256xf32> to vector<8x256xf32>
    %120 = arith.mulf %116, %119 : vector<8x256xf32>
    %c24_70 = arith.constant 24 : index
    %c0_71 = arith.constant 0 : index
    %121 = vector.load %arg12[%c24_70, %c0_71] : memref<72x256xf32, #tpu.memory_space<vmem>>, vector<8x256xf32>
    tpu.vector_store %arg12[%c24_70, %c0_71], %120 {strides = array<i32>} : memref<72x256xf32, #tpu.memory_space<vmem>>, vector<8x256xf32>,
    %c4_72 = arith.constant 4 : index
    %c0_73 = arith.constant 0 : index
    %c0_74 = arith.constant 0 : index
    %122 = vector.load %arg6[%c4_72, %c0_73, %c0_74] : memref<9x1x256xf32, #tpu.memory_space<vmem>>, vector<1x1x256xf32>
    %123 = vector.shape_cast %122 : vector<1x1x256xf32> to vector<1x256xf32>
    %124 = vector.broadcast %123 : vector<1x256xf32> to vector<8x256xf32>
    %125 = arith.mulf %83, %124 : vector<8x256xf32>
    %c32_75 = arith.constant 32 : index
    %c0_76 = arith.constant 0 : index
    %126 = vector.load %arg12[%c32_75, %c0_76] : memref<72x256xf32, #tpu.memory_space<vmem>>, vector<8x256xf32>
    tpu.vector_store %arg12[%c32_75, %c0_76], %125 {strides = array<i32>} : memref<72x256xf32, #tpu.memory_space<vmem>>, vector<8x256xf32>,
    %127 = vector.extract_strided_slice %83 {offsets = [0, 1], sizes = [8, 255], strides = [1, 1]} : vector<8x256xf32> to vector<8x255xf32>
    %128 = vector.extract_strided_slice %83 {offsets = [0, 0], sizes = [8, 1], strides = [1, 1]} : vector<8x256xf32> to vector<8x1xf32>
    %129 = tpu.concatenate %127, %128 in 1 : vector<8x255xf32>, vector<8x1xf32> -> vector<8x256xf32>
    %c5_77 = arith.constant 5 : index
    %c0_78 = arith.constant 0 : index
    %c0_79 = arith.constant 0 : index
    %130 = vector.load %arg6[%c5_77, %c0_78, %c0_79] : memref<9x1x256xf32, #tpu.memory_space<vmem>>, vector<1x1x256xf32>
    %131 = vector.shape_cast %130 : vector<1x1x256xf32> to vector<1x256xf32>
    %132 = vector.broadcast %131 : vector<1x256xf32> to vector<8x256xf32>
    %133 = arith.mulf %129, %132 : vector<8x256xf32>
    %c40_80 = arith.constant 40 : index
    %c0_81 = arith.constant 0 : index
    %134 = vector.load %arg12[%c40_80, %c0_81] : memref<72x256xf32, #tpu.memory_space<vmem>>, vector<8x256xf32>
    tpu.vector_store %arg12[%c40_80, %c0_81], %133 {strides = array<i32>} : memref<72x256xf32, #tpu.memory_space<vmem>>, vector<8x256xf32>,
    %135 = vector.extract_strided_slice %83 {offsets = [0, 15], sizes = [8, 241], strides = [1, 1]} : vector<8x256xf32> to vector<8x241xf32>
    %136 = vector.extract_strided_slice %83 {offsets = [0, 0], sizes = [8, 15], strides = [1, 1]} : vector<8x256xf32> to vector<8x15xf32>
    %137 = tpu.concatenate %135, %136 in 1 : vector<8x241xf32>, vector<8x15xf32> -> vector<8x256xf32>
    %c6_82 = arith.constant 6 : index
    %c0_83 = arith.constant 0 : index
    %c0_84 = arith.constant 0 : index
    %138 = vector.load %arg6[%c6_82, %c0_83, %c0_84] : memref<9x1x256xf32, #tpu.memory_space<vmem>>, vector<1x1x256xf32>
    %139 = vector.shape_cast %138 : vector<1x1x256xf32> to vector<1x256xf32>
    %140 = vector.broadcast %139 : vector<1x256xf32> to vector<8x256xf32>
    %141 = arith.mulf %137, %140 : vector<8x256xf32>
    %c48_85 = arith.constant 48 : index
    %c0_86 = arith.constant 0 : index
    %142 = vector.load %arg12[%c48_85, %c0_86] : memref<72x256xf32, #tpu.memory_space<vmem>>, vector<8x256xf32>
    tpu.vector_store %arg12[%c48_85, %c0_86], %141 {strides = array<i32>} : memref<72x256xf32, #tpu.memory_space<vmem>>, vector<8x256xf32>,
    %143 = vector.extract_strided_slice %83 {offsets = [0, 16], sizes = [8, 240], strides = [1, 1]} : vector<8x256xf32> to vector<8x240xf32>
    %144 = vector.extract_strided_slice %83 {offsets = [0, 0], sizes = [8, 16], strides = [1, 1]} : vector<8x256xf32> to vector<8x16xf32>
    %145 = tpu.concatenate %143, %144 in 1 : vector<8x240xf32>, vector<8x16xf32> -> vector<8x256xf32>
    %c7_87 = arith.constant 7 : index
    %c0_88 = arith.constant 0 : index
    %c0_89 = arith.constant 0 : index
    %146 = vector.load %arg6[%c7_87, %c0_88, %c0_89] : memref<9x1x256xf32, #tpu.memory_space<vmem>>, vector<1x1x256xf32>
    %147 = vector.shape_cast %146 : vector<1x1x256xf32> to vector<1x256xf32>
    %148 = vector.broadcast %147 : vector<1x256xf32> to vector<8x256xf32>
    %149 = arith.mulf %145, %148 : vector<8x256xf32>
    %c56_90 = arith.constant 56 : index
    %c0_91 = arith.constant 0 : index
    %150 = vector.load %arg12[%c56_90, %c0_91] : memref<72x256xf32, #tpu.memory_space<vmem>>, vector<8x256xf32>
    tpu.vector_store %arg12[%c56_90, %c0_91], %149 {strides = array<i32>} : memref<72x256xf32, #tpu.memory_space<vmem>>, vector<8x256xf32>,
    %151 = vector.extract_strided_slice %83 {offsets = [0, 17], sizes = [8, 239], strides = [1, 1]} : vector<8x256xf32> to vector<8x239xf32>
    %152 = vector.extract_strided_slice %83 {offsets = [0, 0], sizes = [8, 17], strides = [1, 1]} : vector<8x256xf32> to vector<8x17xf32>
    %153 = tpu.concatenate %151, %152 in 1 : vector<8x239xf32>, vector<8x17xf32> -> vector<8x256xf32>
    %c8_92 = arith.constant 8 : index
    %c0_93 = arith.constant 0 : index
    %c0_94 = arith.constant 0 : index
    %154 = vector.load %arg6[%c8_92, %c0_93, %c0_94] : memref<9x1x256xf32, #tpu.memory_space<vmem>>, vector<1x1x256xf32>
    %155 = vector.shape_cast %154 : vector<1x1x256xf32> to vector<1x256xf32>
    %156 = vector.broadcast %155 : vector<1x256xf32> to vector<8x256xf32>
    %157 = arith.mulf %153, %156 : vector<8x256xf32>
    %c64_95 = arith.constant 64 : index
    %c0_96 = arith.constant 0 : index
    %158 = vector.load %arg12[%c64_95, %c0_96] : memref<72x256xf32, #tpu.memory_space<vmem>>, vector<8x256xf32>
    tpu.vector_store %arg12[%c64_95, %c0_96], %157 {strides = array<i32>} : memref<72x256xf32, #tpu.memory_space<vmem>>, vector<8x256xf32>,
    %c0_97 = arith.constant 0 : index
    %c0_98 = arith.constant 0 : index
    %159 = vector.load %arg12[%c0_97, %c0_98] : memref<72x256xf32, #tpu.memory_space<vmem>>, vector<72x256xf32>
    %cst_99 = arith.constant dense<0.000000e+00> : vector<8x256xf32>
    %160 = tpu.matmul %85, %159, %cst_99 {dimension_numbers = #tpu.dot_dimension_numbers<[1], [0], [0], [1], [0, 0, 1, 1], [], []>} : vector<8x72xf32>, vector<72x256xf32>, vector<8x256xf32> -> vector<8x256xf32>
    %161 = vector.broadcast %87 : vector<8x1xf32> to vector<8x256xf32>
    %162 = arith.mulf %160, %161 : vector<8x256xf32>
    %163 = vector.broadcast %89 : vector<8x1xf32> to vector<8x256xf32>
    %164 = arith.addf %162, %163 : vector<8x256xf32>
    %cst_100 = arith.constant 0.000000e+00 : f32
    %165 = vector.broadcast %cst_100 : f32 to vector<8x256xf32>
    %166 = arith.maximumf %164, %165 : vector<8x256xf32>
    %c1_101 = arith.constant 1 : index
    %c0_102 = arith.constant 0 : index
    %c0_103 = arith.constant 0 : index
    %167 = vector.load %arg3[%c1_101, %c0_102, %c0_103] : memref<2x8x72xf32, #tpu.memory_space<vmem>>, vector<1x8x72xf32>
    %168 = vector.shape_cast %167 : vector<1x8x72xf32> to vector<8x72xf32>
    %c2_104 = arith.constant 2 : index
    %c0_105 = arith.constant 0 : index
    %c0_106 = arith.constant 0 : index
    %169 = vector.load %arg4[%c2_104, %c0_105, %c0_106] : memref<3x8x1xf32, #tpu.memory_space<vmem>>, vector<1x8x1xf32>
    %170 = vector.shape_cast %169 : vector<1x8x1xf32> to vector<8x1xf32>
    %c2_107 = arith.constant 2 : index
    %c0_108 = arith.constant 0 : index
    %c0_109 = arith.constant 0 : index
    %171 = vector.load %arg5[%c2_107, %c0_108, %c0_109] : memref<3x8x1xf32, #tpu.memory_space<vmem>>, vector<1x8x1xf32>
    %172 = vector.shape_cast %171 : vector<1x8x1xf32> to vector<8x1xf32>
    %173 = vector.extract_strided_slice %166 {offsets = [0, 239], sizes = [8, 17], strides = [1, 1]} : vector<8x256xf32> to vector<8x17xf32>
    %174 = vector.extract_strided_slice %166 {offsets = [0, 0], sizes = [8, 239], strides = [1, 1]} : vector<8x256xf32> to vector<8x239xf32>
    %175 = tpu.concatenate %173, %174 in 1 : vector<8x17xf32>, vector<8x239xf32> -> vector<8x256xf32>
    %c0_110 = arith.constant 0 : index
    %c0_111 = arith.constant 0 : index
    %c0_112 = arith.constant 0 : index
    %176 = vector.load %arg6[%c0_110, %c0_111, %c0_112] : memref<9x1x256xf32, #tpu.memory_space<vmem>>, vector<1x1x256xf32>
    %177 = vector.shape_cast %176 : vector<1x1x256xf32> to vector<1x256xf32>
    %178 = vector.broadcast %177 : vector<1x256xf32> to vector<8x256xf32>
    %179 = arith.mulf %175, %178 : vector<8x256xf32>
    %c0_113 = arith.constant 0 : index
    %c0_114 = arith.constant 0 : index
    %180 = vector.load %arg12[%c0_113, %c0_114] : memref<72x256xf32, #tpu.memory_space<vmem>>, vector<8x256xf32>
    tpu.vector_store %arg12[%c0_113, %c0_114], %179 {strides = array<i32>} : memref<72x256xf32, #tpu.memory_space<vmem>>, vector<8x256xf32>,
    %181 = vector.extract_strided_slice %166 {offsets = [0, 240], sizes = [8, 16], strides = [1, 1]} : vector<8x256xf32> to vector<8x16xf32>
    %182 = vector.extract_strided_slice %166 {offsets = [0, 0], sizes = [8, 240], strides = [1, 1]} : vector<8x256xf32> to vector<8x240xf32>
    %183 = tpu.concatenate %181, %182 in 1 : vector<8x16xf32>, vector<8x240xf32> -> vector<8x256xf32>
    %c1_115 = arith.constant 1 : index
    %c0_116 = arith.constant 0 : index
    %c0_117 = arith.constant 0 : index
    %184 = vector.load %arg6[%c1_115, %c0_116, %c0_117] : memref<9x1x256xf32, #tpu.memory_space<vmem>>, vector<1x1x256xf32>
    %185 = vector.shape_cast %184 : vector<1x1x256xf32> to vector<1x256xf32>
    %186 = vector.broadcast %185 : vector<1x256xf32> to vector<8x256xf32>
    %187 = arith.mulf %183, %186 : vector<8x256xf32>
    %c8_118 = arith.constant 8 : index
    %c0_119 = arith.constant 0 : index
    %188 = vector.load %arg12[%c8_118, %c0_119] : memref<72x256xf32, #tpu.memory_space<vmem>>, vector<8x256xf32>
    tpu.vector_store %arg12[%c8_118, %c0_119], %187 {strides = array<i32>} : memref<72x256xf32, #tpu.memory_space<vmem>>, vector<8x256xf32>,
    %189 = vector.extract_strided_slice %166 {offsets = [0, 241], sizes = [8, 15], strides = [1, 1]} : vector<8x256xf32> to vector<8x15xf32>
    %190 = vector.extract_strided_slice %166 {offsets = [0, 0], sizes = [8, 241], strides = [1, 1]} : vector<8x256xf32> to vector<8x241xf32>
    %191 = tpu.concatenate %189, %190 in 1 : vector<8x15xf32>, vector<8x241xf32> -> vector<8x256xf32>
    %c2_120 = arith.constant 2 : index
    %c0_121 = arith.constant 0 : index
    %c0_122 = arith.constant 0 : index
    %192 = vector.load %arg6[%c2_120, %c0_121, %c0_122] : memref<9x1x256xf32, #tpu.memory_space<vmem>>, vector<1x1x256xf32>
    %193 = vector.shape_cast %192 : vector<1x1x256xf32> to vector<1x256xf32>
    %194 = vector.broadcast %193 : vector<1x256xf32> to vector<8x256xf32>
    %195 = arith.mulf %191, %194 : vector<8x256xf32>
    %c16_123 = arith.constant 16 : index
    %c0_124 = arith.constant 0 : index
    %196 = vector.load %arg12[%c16_123, %c0_124] : memref<72x256xf32, #tpu.memory_space<vmem>>, vector<8x256xf32>
    tpu.vector_store %arg12[%c16_123, %c0_124], %195 {strides = array<i32>} : memref<72x256xf32, #tpu.memory_space<vmem>>, vector<8x256xf32>,
    %197 = vector.extract_strided_slice %166 {offsets = [0, 255], sizes = [8, 1], strides = [1, 1]} : vector<8x256xf32> to vector<8x1xf32>
    %198 = vector.extract_strided_slice %166 {offsets = [0, 0], sizes = [8, 255], strides = [1, 1]} : vector<8x256xf32> to vector<8x255xf32>
    %199 = tpu.concatenate %197, %198 in 1 : vector<8x1xf32>, vector<8x255xf32> -> vector<8x256xf32>
    %c3_125 = arith.constant 3 : index
    %c0_126 = arith.constant 0 : index
    %c0_127 = arith.constant 0 : index
    %200 = vector.load %arg6[%c3_125, %c0_126, %c0_127] : memref<9x1x256xf32, #tpu.memory_space<vmem>>, vector<1x1x256xf32>
    %201 = vector.shape_cast %200 : vector<1x1x256xf32> to vector<1x256xf32>
    %202 = vector.broadcast %201 : vector<1x256xf32> to vector<8x256xf32>
    %203 = arith.mulf %199, %202 : vector<8x256xf32>
    %c24_128 = arith.constant 24 : index
    %c0_129 = arith.constant 0 : index
    %204 = vector.load %arg12[%c24_128, %c0_129] : memref<72x256xf32, #tpu.memory_space<vmem>>, vector<8x256xf32>
    tpu.vector_store %arg12[%c24_128, %c0_129], %203 {strides = array<i32>} : memref<72x256xf32, #tpu.memory_space<vmem>>, vector<8x256xf32>,
    %c4_130 = arith.constant 4 : index
    %c0_131 = arith.constant 0 : index
    %c0_132 = arith.constant 0 : index
    %205 = vector.load %arg6[%c4_130, %c0_131, %c0_132] : memref<9x1x256xf32, #tpu.memory_space<vmem>>, vector<1x1x256xf32>
    %206 = vector.shape_cast %205 : vector<1x1x256xf32> to vector<1x256xf32>
    %207 = vector.broadcast %206 : vector<1x256xf32> to vector<8x256xf32>
    %208 = arith.mulf %166, %207 : vector<8x256xf32>
    %c32_133 = arith.constant 32 : index
    %c0_134 = arith.constant 0 : index
    %209 = vector.load %arg12[%c32_133, %c0_134] : memref<72x256xf32, #tpu.memory_space<vmem>>, vector<8x256xf32>
    tpu.vector_store %arg12[%c32_133, %c0_134], %208 {strides = array<i32>} : memref<72x256xf32, #tpu.memory_space<vmem>>, vector<8x256xf32>,
    %210 = vector.extract_strided_slice %166 {offsets = [0, 1], sizes = [8, 255], strides = [1, 1]} : vector<8x256xf32> to vector<8x255xf32>
    %211 = vector.extract_strided_slice %166 {offsets = [0, 0], sizes = [8, 1], strides = [1, 1]} : vector<8x256xf32> to vector<8x1xf32>
    %212 = tpu.concatenate %210, %211 in 1 : vector<8x255xf32>, vector<8x1xf32> -> vector<8x256xf32>
    %c5_135 = arith.constant 5 : index
    %c0_136 = arith.constant 0 : index
    %c0_137 = arith.constant 0 : index
    %213 = vector.load %arg6[%c5_135, %c0_136, %c0_137] : memref<9x1x256xf32, #tpu.memory_space<vmem>>, vector<1x1x256xf32>
    %214 = vector.shape_cast %213 : vector<1x1x256xf32> to vector<1x256xf32>
    %215 = vector.broadcast %214 : vector<1x256xf32> to vector<8x256xf32>
    %216 = arith.mulf %212, %215 : vector<8x256xf32>
    %c40_138 = arith.constant 40 : index
    %c0_139 = arith.constant 0 : index
    %217 = vector.load %arg12[%c40_138, %c0_139] : memref<72x256xf32, #tpu.memory_space<vmem>>, vector<8x256xf32>
    tpu.vector_store %arg12[%c40_138, %c0_139], %216 {strides = array<i32>} : memref<72x256xf32, #tpu.memory_space<vmem>>, vector<8x256xf32>,
    %218 = vector.extract_strided_slice %166 {offsets = [0, 15], sizes = [8, 241], strides = [1, 1]} : vector<8x256xf32> to vector<8x241xf32>
    %219 = vector.extract_strided_slice %166 {offsets = [0, 0], sizes = [8, 15], strides = [1, 1]} : vector<8x256xf32> to vector<8x15xf32>
    %220 = tpu.concatenate %218, %219 in 1 : vector<8x241xf32>, vector<8x15xf32> -> vector<8x256xf32>
    %c6_140 = arith.constant 6 : index
    %c0_141 = arith.constant 0 : index
    %c0_142 = arith.constant 0 : index
    %221 = vector.load %arg6[%c6_140, %c0_141, %c0_142] : memref<9x1x256xf32, #tpu.memory_space<vmem>>, vector<1x1x256xf32>
    %222 = vector.shape_cast %221 : vector<1x1x256xf32> to vector<1x256xf32>
    %223 = vector.broadcast %222 : vector<1x256xf32> to vector<8x256xf32>
    %224 = arith.mulf %220, %223 : vector<8x256xf32>
    %c48_143 = arith.constant 48 : index
    %c0_144 = arith.constant 0 : index
    %225 = vector.load %arg12[%c48_143, %c0_144] : memref<72x256xf32, #tpu.memory_space<vmem>>, vector<8x256xf32>
    tpu.vector_store %arg12[%c48_143, %c0_144], %224 {strides = array<i32>} : memref<72x256xf32, #tpu.memory_space<vmem>>, vector<8x256xf32>,
    %226 = vector.extract_strided_slice %166 {offsets = [0, 16], sizes = [8, 240], strides = [1, 1]} : vector<8x256xf32> to vector<8x240xf32>
    %227 = vector.extract_strided_slice %166 {offsets = [0, 0], sizes = [8, 16], strides = [1, 1]} : vector<8x256xf32> to vector<8x16xf32>
    %228 = tpu.concatenate %226, %227 in 1 : vector<8x240xf32>, vector<8x16xf32> -> vector<8x256xf32>
    %c7_145 = arith.constant 7 : index
    %c0_146 = arith.constant 0 : index
    %c0_147 = arith.constant 0 : index
    %229 = vector.load %arg6[%c7_145, %c0_146, %c0_147] : memref<9x1x256xf32, #tpu.memory_space<vmem>>, vector<1x1x256xf32>
    %230 = vector.shape_cast %229 : vector<1x1x256xf32> to vector<1x256xf32>
    %231 = vector.broadcast %230 : vector<1x256xf32> to vector<8x256xf32>
    %232 = arith.mulf %228, %231 : vector<8x256xf32>
    %c56_148 = arith.constant 56 : index
    %c0_149 = arith.constant 0 : index
    %233 = vector.load %arg12[%c56_148, %c0_149] : memref<72x256xf32, #tpu.memory_space<vmem>>, vector<8x256xf32>
    tpu.vector_store %arg12[%c56_148, %c0_149], %232 {strides = array<i32>} : memref<72x256xf32, #tpu.memory_space<vmem>>, vector<8x256xf32>,
    %234 = vector.extract_strided_slice %166 {offsets = [0, 17], sizes = [8, 239], strides = [1, 1]} : vector<8x256xf32> to vector<8x239xf32>
    %235 = vector.extract_strided_slice %166 {offsets = [0, 0], sizes = [8, 17], strides = [1, 1]} : vector<8x256xf32> to vector<8x17xf32>
    %236 = tpu.concatenate %234, %235 in 1 : vector<8x239xf32>, vector<8x17xf32> -> vector<8x256xf32>
    %c8_150 = arith.constant 8 : index
    %c0_151 = arith.constant 0 : index
    %c0_152 = arith.constant 0 : index
    %237 = vector.load %arg6[%c8_150, %c0_151, %c0_152] : memref<9x1x256xf32, #tpu.memory_space<vmem>>, vector<1x1x256xf32>
    %238 = vector.shape_cast %237 : vector<1x1x256xf32> to vector<1x256xf32>
    %239 = vector.broadcast %238 : vector<1x256xf32> to vector<8x256xf32>
    %240 = arith.mulf %236, %239 : vector<8x256xf32>
    %c64_153 = arith.constant 64 : index
    %c0_154 = arith.constant 0 : index
    %241 = vector.load %arg12[%c64_153, %c0_154] : memref<72x256xf32, #tpu.memory_space<vmem>>, vector<8x256xf32>
    tpu.vector_store %arg12[%c64_153, %c0_154], %240 {strides = array<i32>} : memref<72x256xf32, #tpu.memory_space<vmem>>, vector<8x256xf32>,
    %c0_155 = arith.constant 0 : index
    %c0_156 = arith.constant 0 : index
    %242 = vector.load %arg12[%c0_155, %c0_156] : memref<72x256xf32, #tpu.memory_space<vmem>>, vector<72x256xf32>
    %cst_157 = arith.constant dense<0.000000e+00> : vector<8x256xf32>
    %243 = tpu.matmul %168, %242, %cst_157 {dimension_numbers = #tpu.dot_dimension_numbers<[1], [0], [0], [1], [0, 0, 1, 1], [], []>} : vector<8x72xf32>, vector<72x256xf32>, vector<8x256xf32> -> vector<8x256xf32>
    %244 = vector.broadcast %170 : vector<8x1xf32> to vector<8x256xf32>
    %245 = arith.mulf %243, %244 : vector<8x256xf32>
    %246 = vector.broadcast %172 : vector<8x1xf32> to vector<8x256xf32>
    %247 = arith.addf %245, %246 : vector<8x256xf32>
    %cst_158 = arith.constant 0.000000e+00 : f32
    %248 = vector.broadcast %cst_158 : f32 to vector<8x256xf32>
    %249 = arith.maximumf %247, %248 : vector<8x256xf32>
    %c0_159 = arith.constant 0 : index
    %c0_160 = arith.constant 0 : index
    %c0_161 = arith.constant 0 : index
    %250 = vector.load %arg9[%c0_159, %c0_160, %c0_161] : memref<1x8x256xf32, #tpu.memory_space<vmem>>, vector<1x8x256xf32>
    %251 = vector.shape_cast %250 : vector<1x8x256xf32> to vector<8x256xf32>
    %252 = vector.shape_cast %249 : vector<8x256xf32> to vector<1x8x256xf32>
    tpu.vector_store %arg9[%c0_159, %c0_160, %c0_161], %252 {strides = array<i32>} : memref<1x8x256xf32, #tpu.memory_space<vmem>>, vector<1x8x256xf32>,
    %c0_162 = arith.constant 0 : index
    %c0_163 = arith.constant 0 : index
    %c0_164 = arith.constant 0 : index
    %253 = vector.load %arg7[%c0_162, %c0_163, %c0_164] : memref<4x256x64xf32, #tpu.memory_space<vmem>>, vector<1x256x64xf32>
    %254 = vector.shape_cast %253 : vector<1x256x64xf32> to vector<256x64xf32>
    %cst_165 = arith.constant dense<0.000000e+00> : vector<8x64xf32>
    %255 = tpu.matmul %249, %254, %cst_165 {dimension_numbers = #tpu.dot_dimension_numbers<[1], [0], [0], [1], [0, 0, 1, 1], [], []>} : vector<8x256xf32>, vector<256x64xf32>, vector<8x64xf32> -> vector<8x64xf32>
    %c1_166 = arith.constant 1 : index
    %c0_167 = arith.constant 0 : index
    %c0_168 = arith.constant 0 : index
    %256 = vector.load %arg7[%c1_166, %c0_167, %c0_168] : memref<4x256x64xf32, #tpu.memory_space<vmem>>, vector<1x256x64xf32>
    %257 = vector.shape_cast %256 : vector<1x256x64xf32> to vector<256x64xf32>
    %cst_169 = arith.constant dense<0.000000e+00> : vector<8x64xf32>
    %258 = tpu.matmul %249, %257, %cst_169 {dimension_numbers = #tpu.dot_dimension_numbers<[1], [0], [0], [1], [0, 0, 1, 1], [], []>} : vector<8x256xf32>, vector<256x64xf32>, vector<8x64xf32> -> vector<8x64xf32>
    %c2_170 = arith.constant 2 : index
    %c0_171 = arith.constant 0 : index
    %c0_172 = arith.constant 0 : index
    %259 = vector.load %arg7[%c2_170, %c0_171, %c0_172] : memref<4x256x64xf32, #tpu.memory_space<vmem>>, vector<1x256x64xf32>
    %260 = vector.shape_cast %259 : vector<1x256x64xf32> to vector<256x64xf32>
    %cst_173 = arith.constant dense<0.000000e+00> : vector<8x64xf32>
    %261 = tpu.matmul %249, %260, %cst_173 {dimension_numbers = #tpu.dot_dimension_numbers<[1], [0], [0], [1], [0, 0, 1, 1], [], []>} : vector<8x256xf32>, vector<256x64xf32>, vector<8x64xf32> -> vector<8x64xf32>
    %c3_174 = arith.constant 3 : index
    %c0_175 = arith.constant 0 : index
    %c0_176 = arith.constant 0 : index
    %262 = vector.load %arg7[%c3_174, %c0_175, %c0_176] : memref<4x256x64xf32, #tpu.memory_space<vmem>>, vector<1x256x64xf32>
    %263 = vector.shape_cast %262 : vector<1x256x64xf32> to vector<256x64xf32>
    %cst_177 = arith.constant dense<0.000000e+00> : vector<8x64xf32>
    %264 = tpu.matmul %249, %263, %cst_177 {dimension_numbers = #tpu.dot_dimension_numbers<[1], [0], [0], [1], [0, 0, 1, 1], [], []>} : vector<8x256xf32>, vector<256x64xf32>, vector<8x64xf32> -> vector<8x64xf32>
    %c0_i32 = arith.constant 0 : i32
    %265 = vector.broadcast %c0_i32 : i32 to vector<8x64xi32>
    %266 = arith.cmpf ogt, %258, %255 : vector<8x64xf32>
    %267 = arith.select %266, %258, %255 : vector<8x64xi1>, vector<8x64xf32>
    %c1_i32 = arith.constant 1 : i32
    %268 = vector.broadcast %c1_i32 : i32 to vector<8x64xi32>
    %269 = arith.select %266, %268, %265 : vector<8x64xi1>, vector<8x64xi32>
    %270 = arith.cmpf ogt, %261, %267 : vector<8x64xf32>
    %271 = arith.select %270, %261, %267 : vector<8x64xi1>, vector<8x64xf32>
    %c16_i32 = arith.constant 16 : i32
    %272 = vector.broadcast %c16_i32 : i32 to vector<8x64xi32>
    %273 = arith.select %270, %272, %269 : vector<8x64xi1>, vector<8x64xi32>
    %274 = arith.cmpf ogt, %264, %271 : vector<8x64xf32>
    %275 = arith.select %274, %264, %271 : vector<8x64xi1>, vector<8x64xf32>
    %c17_i32 = arith.constant 17 : i32
    %276 = vector.broadcast %c17_i32 : i32 to vector<8x64xi32>
    %277 = arith.select %274, %276, %273 : vector<8x64xi1>, vector<8x64xi32>
    %c0_178 = arith.constant 0 : index
    %c0_179 = arith.constant 0 : index
    %c0_180 = arith.constant 0 : index
    %278 = vector.load %arg10[%c0_178, %c0_179, %c0_180] : memref<1x8x64xf32, #tpu.memory_space<vmem>>, vector<1x8x64xf32>
    %279 = vector.shape_cast %278 : vector<1x8x64xf32> to vector<8x64xf32>
    %280 = vector.shape_cast %275 : vector<8x64xf32> to vector<1x8x64xf32>
    tpu.vector_store %arg10[%c0_178, %c0_179, %c0_180], %280 {strides = array<i32>} : memref<1x8x64xf32, #tpu.memory_space<vmem>>, vector<1x8x64xf32>,
    %c0_181 = arith.constant 0 : index
    %c0_182 = arith.constant 0 : index
    %281 = vector.load %arg8[%c0_181, %c0_182] : memref<1x64xi32, #tpu.memory_space<vmem>>, vector<1x64xi32>
    %282 = vector.broadcast %281 : vector<1x64xi32> to vector<8x64xi32>
    %283 = arith.addi %277, %282 : vector<8x64xi32>
    %c0_183 = arith.constant 0 : index
    %c0_184 = arith.constant 0 : index
    %c0_185 = arith.constant 0 : index
    %284 = vector.load %arg11[%c0_183, %c0_184, %c0_185] : memref<1x8x64xi32, #tpu.memory_space<vmem>>, vector<1x8x64xi32>
    %285 = vector.shape_cast %284 : vector<1x8x64xi32> to vector<8x64xi32>
    %286 = vector.shape_cast %283 : vector<8x64xi32> to vector<1x8x64xi32>
    tpu.vector_store %arg11[%c0_183, %c0_184, %c0_185], %286 {strides = array<i32>} : memref<1x8x64xi32, #tpu.memory_space<vmem>>, vector<1x8x64xi32>,
    return
  }
  func.func @transform_0(%arg0: i32) -> (i32, i32, i32) {
    %c0_i32 = arith.constant 0 : i32
    %c0_i32_0 = arith.constant 0 : i32
    %c0_i32_1 = arith.constant 0 : i32
    return %arg0, %c0_i32, %c0_i32_0 : i32, i32, i32
  }
  func.func @transform_1(%arg0: i32) -> (i32, i32) {
    %c0_i32 = arith.constant 0 : i32
    %c0_i32_0 = arith.constant 0 : i32
    %c0_i32_1 = arith.constant 0 : i32
    return %c0_i32, %c0_i32_0 : i32, i32
  }
  func.func @transform_2(%arg0: i32) -> (i32, i32, i32) {
    %c0_i32 = arith.constant 0 : i32
    %c0_i32_0 = arith.constant 0 : i32
    %c0_i32_1 = arith.constant 0 : i32
    %c0_i32_2 = arith.constant 0 : i32
    return %c0_i32, %c0_i32_0, %c0_i32_1 : i32, i32, i32
  }
  func.func @transform_3(%arg0: i32) -> (i32, i32, i32) {
    %c0_i32 = arith.constant 0 : i32
    %c0_i32_0 = arith.constant 0 : i32
    %c0_i32_1 = arith.constant 0 : i32
    %c0_i32_2 = arith.constant 0 : i32
    return %c0_i32, %c0_i32_0, %c0_i32_1 : i32, i32, i32
  }
  func.func @transform_4(%arg0: i32) -> (i32, i32, i32) {
    %c0_i32 = arith.constant 0 : i32
    %c0_i32_0 = arith.constant 0 : i32
    %c0_i32_1 = arith.constant 0 : i32
    %c0_i32_2 = arith.constant 0 : i32
    return %c0_i32, %c0_i32_0, %c0_i32_1 : i32, i32, i32
  }
  func.func @transform_5(%arg0: i32) -> (i32, i32, i32) {
    %c0_i32 = arith.constant 0 : i32
    %c0_i32_0 = arith.constant 0 : i32
    %c0_i32_1 = arith.constant 0 : i32
    %c0_i32_2 = arith.constant 0 : i32
    return %c0_i32, %c0_i32_0, %c0_i32_1 : i32, i32, i32
  }
  func.func @transform_6(%arg0: i32) -> (i32, i32, i32) {
    %c0_i32 = arith.constant 0 : i32
    %c0_i32_0 = arith.constant 0 : i32
    %c0_i32_1 = arith.constant 0 : i32
    %c0_i32_2 = arith.constant 0 : i32
    return %c0_i32, %c0_i32_0, %c0_i32_1 : i32, i32, i32
  }
  func.func @transform_7(%arg0: i32) -> (i32, i32) {
    %c0_i32 = arith.constant 0 : i32
    %c0_i32_0 = arith.constant 0 : i32
    %c0_i32_1 = arith.constant 0 : i32
    return %c0_i32, %c0_i32_0 : i32, i32
  }
  func.func @transform_8(%arg0: i32) -> (i32, i32, i32) {
    %c0_i32 = arith.constant 0 : i32
    %c0_i32_0 = arith.constant 0 : i32
    %c0_i32_1 = arith.constant 0 : i32
    return %arg0, %c0_i32, %c0_i32_0 : i32, i32, i32
  }
  func.func @transform_9(%arg0: i32) -> (i32, i32, i32) {
    %c0_i32 = arith.constant 0 : i32
    %c0_i32_0 = arith.constant 0 : i32
    %c0_i32_1 = arith.constant 0 : i32
    return %arg0, %c0_i32, %c0_i32_0 : i32, i32, i32
  }
  func.func @transform_10(%arg0: i32) -> (i32, i32, i32) {
    %c0_i32 = arith.constant 0 : i32
    %c0_i32_0 = arith.constant 0 : i32
    %c0_i32_1 = arith.constant 0 : i32
    return %arg0, %c0_i32, %c0_i32_0 : i32, i32, i32
  }
}

</mosaic_0001>

<bundles_post_ra>
// kernel: tpu_custom_call.1
= control target key start
LH: loop header
LB: loop body
LE: loop exit
PB: predicated region body
PF: predicated region fallthrough
CT: control target
= control target key end

     0   :  { %s3614_s0 = inlined_call_operand.vmem [shape: f32[2,8,256], index: 0, kind: input, shape index: {}]   ;;  %s3615_s1 = inlined_call_operand.vmem [shape: f32[8,72], index: 1, kind: input, shape index: {}]   ;;  %s3616_s2 = inlined_call_operand.vmem [shape: f32[2,8,72], index: 2, kind: input, shape index: {}]   ;;  %s3617_s3 = inlined_call_operand.vmem [shape: f32[3,8,1], index: 3, kind: input, shape index: {}]   ;;  %s3618_s4 = inlined_call_operand.vmem [shape: f32[3,8,1], index: 4, kind: input, shape index: {}]   ;;  %s3619_s5 = inlined_call_operand.vmem [shape: f32[9,1,256], index: 5, kind: input, shape index: {}]   ;;  %s3620_s6 = inlined_call_operand.vmem [shape: f32[4,256,64], index: 6, kind: input, shape index: {}]   ;;  %s3621_s7 = inlined_call_operand.vmem [shape: s32[1,64], index: 7, kind: input, shape index: {}]   ;;  %s3622_s8 = inlined_call_operand.hbm [shape: f32[2,8,256], index: 8, kind: output, shape index: {0}]   ;;  %s3623_s9 = inlined_call_operand.hbm [shape: f32[2,8,64], index: 9, kind: output, shape index: {1}]   ;;  %s3624_s10 = inlined_call_operand.hbm [shape: s32[2,8,64], index: 10, kind: output, shape index: {2}]  }
   0x1   :  { %3642 = sst [smem:[#allocation10_spill]] %s3614_s0 }
   0x2   :  { %3643 = sst [smem:[#allocation11_spill]] %s3615_s1 }
   0x3   :  { %3644 = sst [smem:[#allocation12_spill]] %s3616_s2 }
   0x4   :  { %16 = vsyncpa [#allocation4], 0 }
   0x5   :  { %18 = vsyncpa [#allocation4 + $0x1], 0 }
   0x6   :  { %19 = vsyncpa [#allocation6], 0 }
   0x7   :  { %21 = vsyncpa [#allocation6 + $0x1], 0  ;;  %s2707_s13 = smov 0   ;;  %s2709_s14 = smov 0  }
   0x8   :  { %s2711_s15 = smov 0   ;;  %s2713_s16 = smov 0  }
   0x9 LB: > { %s2728_s17 = sadd.s32 4294967295, %s2637_s16   ;;  %s3625_s18 = sadd.s32 4294967294, %s2637_s16   ;;  %s2637_s16 = sphi %s2713_s16, %s3662_s16   ;;  %s2633_s15 = sphi %s2711_s15, %s3661_s15   ;;  %s2629_s14 = sphi %s2709_s14, %s3660_s14   ;;  %s2625_s13 = sphi %s2707_s13, %s3659_s13  }
   0xa   : > { %s2732_s19 = sadd.s32 1, %s2637_s16   ;;  %s207_s20 = sadd.s32 1, %s2633_s15 }
   0xb   : > { %s204_s21 = ssub.s32 %s2637_s16, %s2732_s19  ;;  %p217_p0 = scmp.ne.s32.totalorder %s2633_s15, %s2629_s14 }
   0xc   : > { %p205_p1 = scmp.eq.s32.totalorder %s204_s21, 0  ;;  %p218_p2 = scmp.eq.s32.totalorder %s2728_s17, 1 }
   0xd   : > { %p223_p3 = scmp.ne.s32.totalorder %s2629_s14, %s2625_s13  ;;  %p224_p4 = scmp.eq.s32.totalorder %s3625_s18, 1 }
   0xe   : > { %s2745_s22 = scalar_select %p205_p1, %s2633_s15, %s207_s20  }
   0xf   : > { %p2747_p5 = por %p218_p2, %p217_p0  ;;  %p2751_p6 = por %p224_p4, %p223_p3 }
  0x10   : > { %p1992_p7 = scmp.ge.s32.totalorder %s2637_s16, 1  ;;  %p323_p8 = scmp.lt.s32.totalorder %s2637_s16, 3 }
  0x12   : > { %p324_p9 = pnand %p1992_p7, %p323_p8 }
  0x13   : > { %p371_p10 = scmp.lt.s32.totalorder (!%p324_p9), %s2728_s17, 1  ;;  %s3647_s0 = sld [smem:[#allocation10_spill]] (!%p324_p9)  ;;  %v2645_v2 = vmov (!%p324_p9), 0.0   ;;  %v2646_v3 = vmov (!%p324_p9), 0   ;;  %v379_v4 = vld [vmem:[%s3617_s3] sm:$0xff] (!%p324_p9)  ;;  %v395_v6 = vlaneseq (!%p324_p9)  ;;  %vm414_vm0 = vcmask (!%p324_p9), 130048  }
  0x14   : > { %327 = sbr.rel (%p324_p9) target bundleno = 1425 (0x591), region = 52  ;;  %s3636_s30 = smov (!%p324_p9), 16   ;;  %701 = vmatprep.mubr.f32.mxu0 (!%p324_p9), %v2645_v2  ;;  %1032 = vmatprep.mubr.f32.mxu1 (!%p324_p9), %v2645_v2  ;;  %v380_v5 = vld [vmem:[%s3618_s4] sm:$0xff] (!%p324_p9)  ;;  %vm388_vm1 = vcmask (!%p324_p9), 138240   ;;  %vm441_vm2 = vcmask (!%p324_p9), 121856   ;;  %vm468_vm3 = vcmask (!%p324_p9), 7168  }
  0x15   : > { %s3638_s11 = smov (!%p324_p9), 17   ;;  %s3634_s12 = smov (!%p324_p9), 15   ;;  %2513 = vset.pattern.permute.xlu0 (!%p324_p9), %v2646_v3  ;;  %2514 = vset.pattern.permute.xlu1 (!%p324_p9), %v2646_v3  ;;  %v396_v7 = vshrl.u32 (!%p324_p9), %v395_v6, 7  ;;  %v1998_v10 = vld [vmem:[%s3619_s5 + $0x2] sm:$0x3] (!%p324_p9)  ;;  %vm511_vm4 = vcmask (!%p324_p9), 1039360  }
  0x16   : > { %s3630_s20 = smov (!%p324_p9), 1   ;;  %s3640_s21 = smov (!%p324_p9), 127   ;;  %v393_v11 = vld [vmem:[%s3619_s5] sm:$0x3] (!%p324_p9)  ;;  %v1999_v28 = vld [vmem:[%s3619_s5 + $0x4] sm:$0x3] (!%p324_p9) }
  0x17   : > { %s3632_s27 = smov (!%p324_p9), 111   ;;  %v2808_v8 = vsub.s32 (!%p324_p9), 0, %v396_v7  ;;  %v2810_v9 = vsub.s32 (!%p324_p9), 1, %v396_v7  ;;  %v2000_v29 = vld [vmem:[%s3619_s5 + $0x6] sm:$0x3] (!%p324_p9)  ;;  %vm538_vm5 = vcmask (!%p324_p9), 924672  }
  0x18   : > { %v2001_v34 = vld [vmem:[%s3619_s5 + $0x8] sm:$0x3] (!%p324_p9)  ;;  %v2002_v39 = vld [vmem:[%s3619_s5 + $0xa] sm:$0x3] (!%p324_p9)  ;;  %vm565_vm6 = vcmask (!%p324_p9), 916480   ;;  %vm592_vm7 = vcmask (!%p324_p9), 908288  }
  0x19   : > { %v425_v14 = vrot.slane (!%p324_p9), %v1998_v10, %v2808_v8  ;;  %v398_v15 = vrot.slane (!%p324_p9), %v393_v11, %v2808_v8  ;;  %v402_v16 = vrot.slane (!%p324_p9), %v393_v11, %v2810_v9  ;;  %v429_v17 = vrot.slane (!%p324_p9), %v1998_v10, %v2810_v9  ;;  %s3648_s1 = sld [smem:[#allocation11_spill]] (!%p324_p9)  ;;  %s3649_s18 = smov (!%p324_p9), 15  }
  0x1a   : > { %v452_v35 = vrot.slane (!%p324_p9), %v1999_v28, %v2808_v8  ;;  %v456_v36 = vrot.slane (!%p324_p9), %v1999_v28, %v2810_v9  ;;  %v479_v37 = vrot.slane (!%p324_p9), %v2000_v29, %v2808_v8  ;;  %v483_v38 = vrot.slane (!%p324_p9), %v2000_v29, %v2810_v9  ;;  %s3654_s2 = sld [smem:[#allocation12_spill]] (!%p324_p9)  ;;  %s2649_s28 = smov (!%p324_p9), [#allocation3]  }
  0x1b   : > { %s372_s25 = scalar_select %p371_p10, %s2728_s17, 1  ;;  %v500_v44 = vrot.slane %v2001_v34, %v2810_v9  ;;  %v496_v45 = vrot.slane %v2001_v34, %v2808_v8  ;;  %v523_v48 = vrot.slane %v2002_v39, %v2808_v8  ;;  %v527_v49 = vrot.slane %v2002_v39, %v2810_v9 }
  0x1c   : > { %vm633_vm8 = vcmask 588800  }
  0x1d   : > { %s2136_s26 = sshll.u32 %s372_s25, 4  ;;  %s3626_s25 = smov 113  }
  0x1e   : > { %s375_s29 = scalar_lea.vmem %s3647_s0, %s2136_s26  ;;  %s3628_s26 = smov 112  }
  0x1f   : > { %v2762_v0 = vld [vmem:[%s375_s29 + $0x8] sm:$0xff]  ;;  %v2768_v1 = vld [vmem:[%s375_s29] sm:$0xff]  ;;  %s3655_s0 = smov 127  }
  0x20   : > { %409 = vrot.lane.b32.xlu1 %v2762_v0, %s3636_s30  ;;  %382 = vrot.lane.b32.xlu0 %v2762_v0, %s3638_s11  ;;  %v504_v58 = vmul.f32 %v500_v44, %v2762_v0  ;;  %v503_v59 = vmul.f32 %v496_v45, %v2768_v1 }
  0x24   : > { %412 = vrot.lane.b32.xlu1 %v2768_v1, %s3636_s30  ;;  %386 = vrot.lane.b32.xlu0 %v2768_v1, %s3638_s11 }
  0x28   : > { %439 = vrot.lane.b32.xlu1 %v2768_v1, %s3634_s12  ;;  %436 = vrot.lane.b32.xlu0 %v2762_v0, %s3634_s12  ;;  %s3650_s12 = smov 1  }
  0x2c   : > { %466 = vrot.lane.b32.xlu1 %v2768_v1, %s3630_s20  ;;  %463 = vrot.lane.b32.xlu0 %v2762_v0, %s3630_s20  ;;  %s3651_s20 = smov 113  }
  0x30   : > { %509 = vrot.lane.b32.xlu1 %v2762_v0, %s3640_s21  ;;  %507 = vrot.lane.b32.xlu0 %v2768_v1, %s3640_s21 }
  0x34   : > { %536 = vrot.lane.b32.xlu1 %v2762_v0, %s3626_s25  ;;  %534 = vrot.lane.b32.xlu0 %v2768_v1, %s3626_s25  ;;  %s3652_s25 = smov 112  }
  0x38   : > { %563 = vrot.lane.b32.xlu1 %v2762_v0, %s3628_s26  ;;  %561 = vrot.lane.b32.xlu0 %v2768_v1, %s3628_s26  ;;  %s3653_s26 = smov 111  }
  0x3c   : > { %590 = vrot.lane.b32.xlu1 %v2762_v0, %s3632_s27  ;;  %588 = vrot.lane.b32.xlu0 %v2768_v1, %s3632_s27 }
  0x40   : > { %710 = vperm.xlu0 %2513, %v379_v4   ;;  %717 = vperm.xlu1 %2514, %v380_v5   ;;  %v2003_v4 = vld [vmem:[%s3619_s5 + $0xc] sm:$0x3]  ;;  %v2004_v5 = vld [vmem:[%s3619_s5 + $0xe] sm:$0x3] }
  0x41   : > { %v550_v10 = vrot.slane %v2003_v4, %v2808_v8  ;;  %v554_v11 = vrot.slane %v2003_v4, %v2810_v9 }
  0x92   : > { %v410_v12 = vpop.permute.xlu1 %409  ;;  %v383_v13 = vpop.permute.xlu0 %382 }
  0x96   : > { %v413_v18 = vpop.permute.xlu1 %412  ;;  %v387_v19 = vpop.permute.xlu0 %386 }
  0x97   : > { %v415_v20 = vsel %vm414_vm0, %v413_v18, %v410_v12  ;;  %v418_v21 = vsel %vm414_vm0, %v410_v12, %v413_v18  ;;  %v389_v22 = vsel %vm388_vm1, %v387_v19, %v383_v13  ;;  %v392_v23 = vsel %vm388_vm1, %v383_v13, %v387_v19 }
  0x98   : > { %v432_v24 = vmul.f32 %v425_v14, %v418_v21  ;;  %v405_v25 = vmul.f32 %v398_v15, %v392_v23  ;;  %v406_v26 = vmul.f32 %v402_v16, %v389_v22  ;;  %v433_v27 = vmul.f32 %v429_v17, %v415_v20  ;;  %v2005_v14 = vld [vmem:[%s3619_s5 + $0x10] sm:$0x3] }
  0x99   : > { %v577_v12 = vrot.slane %v2004_v5, %v2808_v8  ;;  %v581_v13 = vrot.slane %v2004_v5, %v2810_v9  ;;  %v608_v21 = vrot.slane %v2005_v14, %v2810_v9 }
  0x9a   : > { %v440_v30 = vpop.permute.xlu1 %439  ;;  %v437_v31 = vpop.permute.xlu0 %436  ;;  %v2278_v32 = vpack.c.bf16 %v433_v27, %v406_v26  ;;  %v2280_v33 = vpack.c.bf16 %v432_v24, %v405_v25  ;;  %v604_v26 = vrot.slane %v2005_v14, %v2808_v8 }
  0x9b   : > { %v442_v40 = vsel %vm441_vm2, %v440_v30, %v437_v31  ;;  %v445_v41 = vsel %vm441_vm2, %v437_v31, %v440_v30 }
  0x9c   : > { %2279 = vmatprep.subr.bf16.mxu0 %v2278_v32  ;;  %v459_v50 = vmul.f32 %v452_v35, %v445_v41  ;;  %v460_v51 = vmul.f32 %v456_v36, %v442_v40  ;;  %v378_v35 = vld [vmem:[%s3648_s1] sm:$0xff]  ;;  %s3656_s1 = smov 17  }
  0x9d   : > { %2281 = vmatpush1.bf16.msra.mxu0 %v2280_v33 }
  0x9e   : > { %v467_v42 = vpop.permute.xlu1 %466  ;;  %v464_v43 = vpop.permute.xlu0 %463 }
  0x9f   : > { %v469_v46 = vsel %vm468_vm3, %v467_v42, %v464_v43  ;;  %v472_v47 = vsel %vm468_vm3, %v464_v43, %v467_v42 }
  0xa0   : > { %v486_v52 = vmul.f32 %v479_v37, %v472_v47  ;;  %v487_v53 = vmul.f32 %v483_v38, %v469_v46  ;;  %v2007_v46 = vld [vmem:[%s3617_s3 + $0x8] sm:$0xff] }
  0xa2   : > { %v510_v54 = vpop.permute.xlu1 %509  ;;  %v508_v55 = vpop.permute.xlu0 %507  ;;  %v2282_v56 = vpack.c.bf16 %v487_v53, %v460_v51  ;;  %v2284_v57 = vpack.c.bf16 %v486_v52, %v459_v50  ;;  %v2009_v50 = vld [vmem:[%s3619_s5 + $0x2] sm:$0x3] }
  0xa3   : > { %v512_v60 = vsel %vm511_vm4, %v508_v55, %v510_v54  ;;  %v516_v61 = vsel %vm511_vm4, %v510_v54, %v508_v55  ;;  %v770_v54 = vrot.slane %v2009_v50, %v2808_v8 }
  0xa4   : > { %v530_v62 = vmul.f32 %v523_v48, %v512_v60  ;;  %v531_v63 = vmul.f32 %v527_v49, %v516_v61  ;;  %2283 = vmatprep.subr.bf16.mxu0 %v2282_v56  ;;  %v740_v49 = vld [vmem:[%s3619_s5] sm:$0x3]  ;;  %v774_v56 = vrot.slane %v2009_v50, %v2810_v9  ;;  %v2016_v50 = vld [vmem:[%s3619_s5 + $0x10] sm:$0x3] }
  0xa5   : > { %2285 = vmatpush1.bf16.msra.mxu0 %v2284_v57  ;;  %v745_v53 = vrot.slane %v740_v49, %v2808_v8  ;;  %v749_v55 = vrot.slane %v740_v49, %v2810_v9 }
  0xa6   : > { %v537_v6 = vpop.permute.xlu1 %536  ;;  %v535_v0 = vpop.permute.xlu0 %534  ;;  %v2286_v1 = vpack.c.bf16 %v531_v63, %v504_v58  ;;  %v2288_v7 = vpack.c.bf16 %v530_v62, %v503_v59  ;;  %v2010_v63 = vld [vmem:[%s3619_s5 + $0x4] sm:$0x3] }
  0xa7   : > { %v539_v15 = vsel %vm538_vm5, %v535_v0, %v537_v6  ;;  %v543_v16 = vsel %vm538_vm5, %v537_v6, %v535_v0 }
  0xa8   : > { %2287 = vmatprep.subr.bf16.mxu0 %v2286_v1  ;;  %v557_v22 = vmul.f32 %v550_v10, %v539_v15  ;;  %v558_v23 = vmul.f32 %v554_v11, %v543_v16  ;;  %v2013_v1 = vld [vmem:[%s3619_s5 + $0xa] sm:$0x3]  ;;  %v795_v11 = vrot.slane %v2010_v63, %v2808_v8  ;;  %v799_v15 = vrot.slane %v2010_v63, %v2810_v9 }
  0xa9   : > { %2289 = vmatpush1.bf16.msra.mxu0 %v2288_v7  ;;  %v2011_v7 = vld [vmem:[%s3619_s5 + $0x6] sm:$0x3] }
  0xaa   : > { %v564_v17 = vpop.permute.xlu1 %563  ;;  %v562_v18 = vpop.permute.xlu0 %561 }
  0xab   : > { %v566_v19 = vsel %vm565_vm6, %v562_v18, %v564_v17  ;;  %v570_v20 = vsel %vm565_vm6, %v564_v17, %v562_v18  ;;  %v2012_v17 = vld [vmem:[%s3619_s5 + $0x8] sm:$0x3] }
  0xac   : > { %v584_v24 = vmul.f32 %v577_v12, %v566_v19  ;;  %v585_v25 = vmul.f32 %v581_v13, %v570_v20  ;;  %v865_v19 = vrot.slane %v2013_v1, %v2810_v9  ;;  %v820_v20 = vrot.slane %v2011_v7, %v2808_v8 }
  0xae   : > { %v591_v27 = vpop.permute.xlu1 %590  ;;  %v589_v28 = vpop.permute.xlu0 %588  ;;  %v2290_v29 = vpack.c.bf16 %v585_v25, %v558_v23  ;;  %v2292_v30 = vpack.c.bf16 %v584_v24, %v557_v22  ;;  %v861_v23 = vrot.slane %v2013_v1, %v2808_v8 }
  0xaf   : > { %v593_v31 = vsel %vm592_vm7, %v589_v28, %v591_v27  ;;  %v597_v32 = vsel %vm592_vm7, %v591_v27, %v589_v28 }
  0xb0   : > { %v612_v33 = vmul.f32 %v608_v21, %v597_v32  ;;  %2291 = vmatprep.subr.bf16.mxu0 %v2290_v29  ;;  %v611_v34 = vmul.f32 %v604_v26, %v593_v31  ;;  %v824_v21 = vrot.slane %v2011_v7, %v2810_v9  ;;  %v840_v26 = vrot.slane %v2012_v17, %v2810_v9 }
  0xb1   : > { %2293 = vmatpush1.bf16.msra.mxu0 %v2292_v30 }
  0xb2   : > { %653 = vmatprep.subr.mxu0 %v612_v33 }
  0xb5   : > { %654 = vmatpush1.msra.mxu0 %v611_v34 }
  0xb6   : > { %2006 = vmatmul.mubr.msk.f32.vlgmr.msra.gmra.mrb[0].mxu0 %vm633_vm8, %v378_v35  ;;  %v2014_v35 = vld [vmem:[%s3619_s5 + $0xc] sm:$0x3] }
  0xb7   : > { %1364 = vmatprep.mubr.f32.mxu0 %v2645_v2  ;;  %v2008_v2 = vld [vmem:[%s3618_s4 + $0x8] sm:$0xff] }
  0xbf   : > { %v711_v36 = vpop.permute.xlu0 %710  ;;  %v718_v38 = vpop.permute.xlu1 %717 }
 0x189   : > { %v703_v37 = vpop.f32.mrb[0].mxu0 }
 0x18a   : > { %v713_v39 = vmul.f32 %v711_v36, %v703_v37  ;;  %v705_v40 = vpop.f32.mrb[1].mxu0  ;;  %v836_v37 = vrot.slane %v2012_v17, %v2808_v8 }
 0x18b   : > { %v714_v41 = vmul.f32 %v711_v36, %v705_v40  ;;  %v2015_v36 = vld [vmem:[%s3619_s5 + $0xe] sm:$0x3] }
 0x18c   : > { %v720_v42 = vadd.f32 %v718_v38, %v713_v39 }
 0x18d   : > { %v721_v43 = vadd.f32 %v718_v38, %v714_v41 }
 0x18e   : > { %v2880_v44 = vmax.f32 %v720_v42, 0.0 }
 0x18f   : > { %v2886_v45 = vmax.f32 %v721_v43, 0.0 }
 0x190   : > { %847 = vrot.lane.b32.xlu1 %v2880_v44, %s3640_s21  ;;  %734 = vrot.lane.b32.xlu0 %v2880_v44, %s3638_s11 }
 0x191   : > { %v844_v42 = vmul.f32 %v840_v26, %v2886_v45 }
 0x194   : > { %759 = vrot.lane.b32.xlu0 %v2880_v44, %s3636_s30  ;;  %730 = vrot.lane.b32.xlu1 %v2886_v45, %s3638_s11 }
 0x198   : > { %784 = vrot.lane.b32.xlu0 %v2880_v44, %s3649_s18  ;;  %756 = vrot.lane.b32.xlu1 %v2886_v45, %s3636_s30  ;;  %s3657_s30 = smov 16  }
 0x19c   : > { %809 = vrot.lane.b32.xlu0 %v2880_v44, %s3650_s12  ;;  %781 = vrot.lane.b32.xlu1 %v2886_v45, %s3649_s18 }
 0x1a0   : > { %849 = vrot.lane.b32.xlu0 %v2886_v45, %s3640_s21  ;;  %806 = vrot.lane.b32.xlu1 %v2886_v45, %s3650_s12 }
 0x1a4   : > { %874 = vrot.lane.b32.xlu0 %v2886_v45, %s3651_s20  ;;  %872 = vrot.lane.b32.xlu1 %v2880_v44, %s3651_s20 }
 0x1a8   : > { %899 = vrot.lane.b32.xlu0 %v2886_v45, %s3652_s25  ;;  %897 = vrot.lane.b32.xlu1 %v2880_v44, %s3652_s25 }
 0x1ac   : > { %924 = vrot.lane.b32.xlu0 %v2886_v45, %s3653_s26  ;;  %922 = vrot.lane.b32.xlu1 %v2880_v44, %s3653_s26  ;;  %v843_v45 = vmul.f32 %v836_v37, %v2880_v44  ;;  %v936_v44 = vrot.slane %v2016_v50, %v2808_v8  ;;  %v1410_v37 = vld [vmem:[%s3620_s6 + $0xa8] sm:$0xff] }
 0x1b0   : > { %1048 = vperm.xlu0 %2513, %v2008_v2   ;;  %1041 = vperm.xlu1 %2514, %v2007_v46   ;;  %v886_v2 = vrot.slane %v2014_v35, %v2808_v8  ;;  %v890_v46 = vrot.slane %v2014_v35, %v2810_v9 }
 0x202   : > { %v848_v47 = vpop.permute.xlu1 %847  ;;  %v735_v48 = vpop.permute.xlu0 %734 }
 0x206   : > { %v760_v51 = vpop.permute.xlu0 %759  ;;  %v731_v52 = vpop.permute.xlu1 %730 }
 0x207   : > { %v736_v57 = vsel %vm388_vm1, %v735_v48, %v731_v52  ;;  %v739_v58 = vsel %vm388_vm1, %v731_v52, %v735_v48  ;;  %v915_v48 = vrot.slane %v2015_v36, %v2810_v9 }
 0x208   : > { %v752_v4 = vmul.f32 %v745_v53, %v739_v58  ;;  %v753_v6 = vmul.f32 %v749_v55, %v736_v57  ;;  %v940_v58 = vrot.slane %v2016_v50, %v2810_v9 }
 0x20a   : > { %v785_v59 = vpop.permute.xlu0 %784  ;;  %v757_v60 = vpop.permute.xlu1 %756 }
 0x20b   : > { %v761_v61 = vsel %vm414_vm0, %v760_v51, %v757_v60  ;;  %v764_v62 = vsel %vm414_vm0, %v757_v60, %v760_v51 }
 0x20c   : > { %v777_v5 = vmul.f32 %v770_v54, %v764_v62  ;;  %v778_v0 = vmul.f32 %v774_v56, %v761_v61 }
 0x20e   : > { %v810_v10 = vpop.permute.xlu0 %809  ;;  %v782_v12 = vpop.permute.xlu1 %781  ;;  %v2294_v13 = vpack.c.bf16 %v778_v0, %v753_v6  ;;  %v2296_v14 = vpack.c.bf16 %v777_v5, %v752_v4 }
 0x20f   : > { %v789_v16 = vsel %vm441_vm2, %v782_v12, %v785_v59  ;;  %v786_v18 = vsel %vm441_vm2, %v785_v59, %v782_v12 }
 0x210   : > { %2295 = vmatprep.subr.bf16.mxu1 %v2294_v13  ;;  %v802_v22 = vmul.f32 %v795_v11, %v789_v16  ;;  %v803_v27 = vmul.f32 %v799_v15, %v786_v18  ;;  %v724_v11 = vld [vmem:[%s3654_s2] sm:$0xff] }
 0x211   : > { %2297 = vmatpush1.bf16.msra.mxu1 %v2296_v14 }
 0x212   : > { %v850_v24 = vpop.permute.xlu0 %849  ;;  %v807_v25 = vpop.permute.xlu1 %806 }
 0x213   : > { %v855_v28 = vsel %vm511_vm4, %v850_v24, %v848_v47  ;;  %v811_v29 = vsel %vm468_vm3, %v810_v10, %v807_v25  ;;  %v814_v30 = vsel %vm468_vm3, %v807_v25, %v810_v10  ;;  %v851_v31 = vsel %vm511_vm4, %v848_v47, %v850_v24  ;;  %v1405_v24 = vld [vmem:[%s3620_s6 + $0x80] sm:$0xff]  ;;  %v1406_v25 = vld [vmem:[%s3620_s6 + $0x88] sm:$0xff] }
 0x214   : > { %v869_v32 = vmul.f32 %v865_v19, %v855_v28  ;;  %v827_v33 = vmul.f32 %v820_v20, %v814_v30  ;;  %v828_v34 = vmul.f32 %v824_v21, %v811_v29  ;;  %v868_v43 = vmul.f32 %v861_v23, %v851_v31  ;;  %v2019_v23 = vld [vmem:[%s3617_s3 + $0x10] sm:$0xff]  ;;  %v1390_v28 = vld [vmem:[%s3620_s6 + $0x8] sm:$0xff]  ;;  %v1408_v31 = vld [vmem:[%s3620_s6 + $0x98] sm:$0xff] }
 0x215   : > { %v911_v47 = vrot.slane %v2015_v36, %v2808_v8  ;;  %v2326_v26 = vpack.c.bf16 %v1406_v25, %v1405_v24  ;;  %v1407_v30 = vld [vmem:[%s3620_s6 + $0x90] sm:$0xff]  ;;  %v1409_v36 = vld [vmem:[%s3620_s6 + $0xa0] sm:$0xff] }
 0x216   : > { %v875_v38 = vpop.permute.xlu0 %874  ;;  %v873_v39 = vpop.permute.xlu1 %872  ;;  %v2298_v40 = vpack.c.bf16 %v828_v34, %v803_v27  ;;  %v2300_v41 = vpack.c.bf16 %v827_v33, %v802_v22  ;;  %v2302_v49 = vpack.c.bf16 %v869_v32, %v844_v42  ;;  %v2304_v57 = vpack.c.bf16 %v868_v43, %v843_v45  ;;  %v2020_v22 = vld [vmem:[%s3618_s4 + $0x10] sm:$0xff]  ;;  %v1389_v27 = vld [vmem:[%s3620_s6] sm:$0xff]  ;;  %v1392_v34 = vld [vmem:[%s3620_s6 + $0x18] sm:$0xff] }
 0x217   : > { %v876_v51 = vsel %vm538_vm5, %v873_v39, %v875_v38  ;;  %v880_v52 = vsel %vm538_vm5, %v875_v38, %v873_v39  ;;  %v2328_v29 = vpack.c.bf16 %v1390_v28, %v1389_v27  ;;  %v2330_v32 = vpack.c.bf16 %v1408_v31, %v1407_v30  ;;  %v1391_v33 = vld [vmem:[%s3620_s6 + $0x10] sm:$0xff]  ;;  %v1393_v39 = vld [vmem:[%s3620_s6 + $0x20] sm:$0xff]  ;;  %v1412_v43 = vld [vmem:[%s3620_s6 + $0xb8] sm:$0xff] }
 0x218   : > { %2299 = vmatprep.subr.bf16.mxu1 %v2298_v40  ;;  %v893_v59 = vmul.f32 %v886_v2, %v876_v51  ;;  %v894_v60 = vmul.f32 %v890_v46, %v880_v52  ;;  %v2332_v35 = vpack.c.bf16 %v1392_v34, %v1391_v33  ;;  %v2334_v38 = vpack.c.bf16 %v1410_v37, %v1409_v36  ;;  %v1394_v40 = vld [vmem:[%s3620_s6 + $0x28] sm:$0xff]  ;;  %v1411_v42 = vld [vmem:[%s3620_s6 + $0xb0] sm:$0xff]  ;;  %v1397_v52 = vld [vmem:[%s3620_s6 + $0x40] sm:$0xff] }
 0x219   : > { %2301 = vmatpush1.bf16.msra.mxu1 %v2300_v41  ;;  %v2336_v41 = vpack.c.bf16 %v1394_v40, %v1393_v39  ;;  %v2338_v2 = vpack.c.bf16 %v1412_v43, %v1411_v42  ;;  %v1395_v46 = vld [vmem:[%s3620_s6 + $0x30] sm:$0xff]  ;;  %v1398_v45 = vld [vmem:[%s3620_s6 + $0x48] sm:$0xff] }
 0x21a   : > { %v900_v53 = vpop.permute.xlu0 %899  ;;  %v898_v54 = vpop.permute.xlu1 %897  ;;  %2303 = vmatprep.subr.bf16.mxu1 %v2302_v49  ;;  %v1414_v49 = vld [vmem:[%s3620_s6 + $0xc8] sm:$0xff] }
 0x21b   : > { %v901_v55 = vsel %vm565_vm6, %v898_v54, %v900_v53  ;;  %v905_v56 = vsel %vm565_vm6, %v900_v53, %v898_v54  ;;  %v1415_v53 = vld [vmem:[%s3620_s6 + $0xd0] sm:$0xff]  ;;  %v1416_v54 = vld [vmem:[%s3620_s6 + $0xd8] sm:$0xff]  ;;  %v2024_v31 = vld [vmem:[%s3619_s5 + $0x8] sm:$0x3] }
 0x21c   : > { %v918_v61 = vmul.f32 %v911_v47, %v901_v55  ;;  %v919_v62 = vmul.f32 %v915_v48, %v905_v56  ;;  %v1396_v47 = vld [vmem:[%s3620_s6 + $0x38] sm:$0xff]  ;;  %v1413_v48 = vld [vmem:[%s3620_s6 + $0xc0] sm:$0xff]  ;;  %v2344_v55 = vpack.c.bf16 %v1398_v45, %v1397_v52  ;;  %v2346_v56 = vpack.c.bf16 %v1416_v54, %v1415_v53  ;;  %v2027_v52 = vld [vmem:[%s3619_s5 + $0xe] sm:$0x3] }
 0x21d   : > { %2305 = vmatpush1.bf16.msra.mxu1 %v2304_v57  ;;  %v2340_v50 = vpack.c.bf16 %v1396_v47, %v1395_v46  ;;  %v2342_v51 = vpack.c.bf16 %v1414_v49, %v1413_v48  ;;  %v1399_v57 = vld [vmem:[%s3620_s6 + $0x50] sm:$0xff]  ;;  %v1172_v40 = vrot.slane %v2024_v31, %v2810_v9 }
 0x21e   : > { %v925_v63 = vpop.permute.xlu0 %924  ;;  %v923_v4 = vpop.permute.xlu1 %922  ;;  %v2306_v5 = vpack.c.bf16 %v919_v62, %v894_v60  ;;  %v2308_v6 = vpack.c.bf16 %v918_v61, %v893_v59  ;;  %v1072_v62 = vld [vmem:[%s3619_s5] sm:$0x3] }
 0x21f   : > { %v930_v0 = vsel %vm592_vm7, %v925_v63, %v923_v4  ;;  %v926_v1 = vsel %vm592_vm7, %v923_v4, %v925_v63  ;;  %v2021_v63 = vld [vmem:[%s3619_s5 + $0x2] sm:$0x3] }
 0x220   : > { %v944_v7 = vmul.f32 %v940_v58, %v930_v0  ;;  %2307 = vmatprep.subr.bf16.mxu1 %v2306_v5  ;;  %v943_v10 = vmul.f32 %v936_v44, %v926_v1  ;;  %v1400_v58 = vld [vmem:[%s3620_s6 + $0x58] sm:$0xff]  ;;  %v1081_v44 = vrot.slane %v1072_v62, %v2810_v9  ;;  %v1102_v0 = vrot.slane %v2021_v63, %v2808_v8 }
 0x221   : > { %2309 = vmatpush1.bf16.msra.mxu1 %v2308_v6  ;;  %v2348_v59 = vpack.c.bf16 %v1400_v58, %v1399_v57  ;;  %v1077_v6 = vrot.slane %v1072_v62, %v2808_v8  ;;  %v1106_v1 = vrot.slane %v2021_v63, %v2810_v9  ;;  %v2028_v63 = vld [vmem:[%s3619_s5 + $0x10] sm:$0x3] }
 0x222   : > { %984 = vmatprep.subr.mxu1 %v944_v7 }
 0x225   : > { %985 = vmatpush1.msra.mxu1 %v943_v10 }
 0x226   : > { %2017 = vmatmul.mubr.msk.f32.vlgmr.msra.gmra.mrb[0].mxu1 %vm633_vm8, %v724_v11  ;;  %2327 = vmatprep.subr.bf16.mxu1 %v2326_v26 }
 0x227   : > { %2329 = vmatpush3.bf16.msra.mxu1 %v2328_v29 }
 0x228   : > { %2331 = vmatprep.subr.bf16.mxu1 %v2330_v32 }
 0x22b   : > { %2333 = vmatpush3.bf16.msra.mxu1 %v2332_v35 }
 0x22c   : > { %2335 = vmatprep.subr.bf16.mxu1 %v2334_v38 }
 0x22f   : > { %v1042_v12 = vpop.permute.xlu1 %1041  ;;  %v1049_v16 = vpop.permute.xlu0 %1048  ;;  %2337 = vmatpush3.bf16.msra.mxu1 %v2336_v41 }
 0x230   : > { %2339 = vmatprep.subr.bf16.mxu1 %v2338_v2 }
 0x233   : > { %2341 = vmatpush3.bf16.msra.mxu1 %v2340_v50  ;;  %v2026_v50 = vld [vmem:[%s3619_s5 + $0xc] sm:$0x3] }
 0x234   : > { %2343 = vmatprep.subr.bf16.mxu1 %v2342_v51  ;;  %v1168_v51 = vrot.slane %v2024_v31, %v2808_v8  ;;  %v1218_v58 = vrot.slane %v2026_v50, %v2808_v8 }
 0x237   : > { %2345 = vmatpush3.bf16.msra.mxu1 %v2344_v55 }
 0x238   : > { %2347 = vmatprep.subr.bf16.mxu1 %v2346_v56 }
 0x23b   : > { %2349 = vmatpush3.bf16.msra.mxu1 %v2348_v59  ;;  %v1222_v59 = vrot.slane %v2026_v50, %v2810_v9 }
 0x2f9   : > { %v1034_v13 = vpop.f32.mrb[0].mxu1 }
 0x2fa   : > { %v1044_v14 = vmul.f32 %v1042_v12, %v1034_v13  ;;  %v1036_v15 = vpop.f32.mrb[1].mxu1 }
 0x2fb   : > { %v1045_v17 = vmul.f32 %v1042_v12, %v1036_v15  ;;  %v2022_v15 = vld [vmem:[%s3619_s5 + $0x4] sm:$0x3] }
 0x2fc   : > { %v1051_v18 = vadd.f32 %v1049_v16, %v1044_v14  ;;  %v1127_v26 = vrot.slane %v2022_v15, %v2808_v8  ;;  %v1131_v29 = vrot.slane %v2022_v15, %v2810_v9 }
 0x2fd   : > { %v1052_v20 = vadd.f32 %v1049_v16, %v1045_v17 }
 0x2fe   : > { %v2989_v19 = vmax.f32 %v1051_v18, 0.0 }
 0x2ff   : > { %v2995_v21 = vmax.f32 %v1052_v20, 0.0 }
 0x300   : > { %1179 = vrot.lane.b32.xlu1 %v2989_v19, %s3655_s0  ;;  %1066 = vrot.lane.b32.xlu0 %v2989_v19, %s3656_s1 }
 0x301   : > { %v1176_v56 = vmul.f32 %v1172_v40, %v2995_v21  ;;  %v2035_v40 = vld [vmem:[%s3620_s6 + $0x128] sm:$0xff] }
 0x304   : > { %1091 = vrot.lane.b32.xlu0 %v2989_v19, %s3657_s30  ;;  %1062 = vrot.lane.b32.xlu1 %v2995_v21, %s3656_s1  ;;  %s2137_s1 = sshll.u32 %s2728_s17, 8 }
 0x308   : > { %1116 = vrot.lane.b32.xlu0 %v2989_v19, %s3649_s18  ;;  %1088 = vrot.lane.b32.xlu1 %v2995_v21, %s3657_s30 }
 0x30c   : > { %1141 = vrot.lane.b32.xlu0 %v2989_v19, %s3650_s12  ;;  %1113 = vrot.lane.b32.xlu1 %v2995_v21, %s3649_s18 }
 0x310   : > { %1181 = vrot.lane.b32.xlu0 %v2995_v21, %s3655_s0  ;;  %1138 = vrot.lane.b32.xlu1 %v2995_v21, %s3650_s12  ;;  %s3501_s12 = scalar_lea.hbm %s3622_s8, %s2137_s1 }
 0x314   : > { %1206 = vrot.lane.b32.xlu0 %v2995_v21, %s3651_s20  ;;  %1204 = vrot.lane.b32.xlu1 %v2989_v19, %s3651_s20  ;;  %s3303_s20 = sand.u32 1, %s2629_s14  }
 0x315   : > { %s1993_s27 = sshll.u32 %s3303_s20, 4  ;;  %s1819_s21 = scalar_lea.sflag [#allocation4], %s3303_s20 }
 0x316   : > { %s3347_s0 = scalar_lea.vmem [#allocation3], %s1993_s27 }
 0x317   : > { %s1843_s11 = sshll.u32 %s3347_s0, 4  ;;  %s1844_s11 = int_to_ptr.vmem [resolvable:$true] %s1843_s11 }
 0x318   : > { %1231 = vrot.lane.b32.xlu0 %v2995_v21, %s3652_s25  ;;  %1229 = vrot.lane.b32.xlu1 %v2989_v19, %s3652_s25  ;;  %s2515_s27 = scalar_lea.vmem %s1844_s11, 256  ;;  %s2519_s25 = sshll.u32 %s2649_s28, 4  ;;  %s2520_s25 = int_to_ptr.vmem [resolvable:$false] %s2519_s25 }
 0x319   : > { %p2516_p11 = scmp.ne.s32.totalorder %s1844_s11, %s2515_s27  ;;  %p2522_p0 = scmp.lt.s32.totalorder %s1844_s11, %s2520_s25 }
 0x31b   : > { %p2517_p12 = pnand %p2516_p11, %p2747_p5 }
 0x31c   : > { %1256 = vrot.lane.b32.xlu0 %v2995_v21, %s3653_s26  ;;  %1254 = vrot.lane.b32.xlu1 %v2989_v19, %s3653_s26  ;;  %s2521_s26 = scalar_lea.vmem %s2520_s25, 512 }
 0x31d   : > { %p2518_p13 = pneg %p2517_p12  ;;  %p2523_p1 = scmp.lt.s32.totalorder %s2521_s26, %s2515_s27 }
 0x31f   : > { %p2524_p2 = por %p2523_p1, %p2522_p0 }
 0x320   : > { %1380 = vperm.xlu0 %2513, %v2020_v22   ;;  %1373 = vperm.xlu1 %2514, %v2019_v23   ;;  %v2025_v22 = vld [vmem:[%s3619_s5 + $0xa] sm:$0x3]  ;;  %v2023_v23 = vld [vmem:[%s3619_s5 + $0x6] sm:$0x3] }
 0x321   : > { %v1197_v33 = vrot.slane %v2025_v22, %v2810_v9  ;;  %v1152_v34 = vrot.slane %v2023_v23, %v2808_v8  ;;  %v1156_v35 = vrot.slane %v2023_v23, %v2810_v9  ;;  %v1193_v37 = vrot.slane %v2025_v22, %v2808_v8  ;;  %v2046_v22 = vld [vmem:[%s3620_s6 + $0x180] sm:$0xff]  ;;  %p2525_p3 = pnand %p2524_p2, %p2518_p13 }
 0x372   : > { %v1180_v60 = vpop.permute.xlu1 %1179  ;;  %v1067_v61 = vpop.permute.xlu0 %1066 }
 0x376   : > { %v1092_v4 = vpop.permute.xlu0 %1091  ;;  %v1063_v5 = vpop.permute.xlu1 %1062 }
 0x377   : > { %v1068_v7 = vsel %vm388_vm1, %v1067_v61, %v1063_v5  ;;  %v1071_v10 = vsel %vm388_vm1, %v1063_v5, %v1067_v61  ;;  %v1247_v61 = vrot.slane %v2027_v52, %v2810_v9 }
 0x378   : > { %v1084_v16 = vmul.f32 %v1077_v6, %v1071_v10  ;;  %v1085_v17 = vmul.f32 %v1081_v44, %v1068_v7  ;;  %v1272_v10 = vrot.slane %v2028_v63, %v2810_v9  ;;  %v2047_v9 = vld [vmem:[%s3620_s6 + $0x188] sm:$0xff] }
 0x37a   : > { %v1117_v11 = vpop.permute.xlu0 %1116  ;;  %v1089_v12 = vpop.permute.xlu1 %1088 }
 0x37b   : > { %v1093_v13 = vsel %vm414_vm0, %v1092_v4, %v1089_v12  ;;  %v1096_v14 = vsel %vm414_vm0, %v1089_v12, %v1092_v4  ;;  %v1175_v4 = vmul.f32 %v1168_v51, %v2989_v19 }
 0x37c   : > { %v1109_v18 = vmul.f32 %v1102_v0, %v1096_v14  ;;  %v1110_v20 = vmul.f32 %v1106_v1, %v1093_v13 }
 0x37e   : > { %v2312_v24 = vpack.c.bf16 %v1109_v18, %v1084_v16  ;;  %v1142_v25 = vpop.permute.xlu0 %1141  ;;  %v1114_v27 = vpop.permute.xlu1 %1113  ;;  %v2310_v28 = vpack.c.bf16 %v1110_v20, %v1085_v17  ;;  %v1268_v18 = vrot.slane %v2028_v63, %v2808_v8 }
 0x37f   : > { %v1121_v30 = vsel %vm441_vm2, %v1114_v27, %v1117_v11  ;;  %v1118_v32 = vsel %vm441_vm2, %v1117_v11, %v1114_v27  ;;  %v2049_v27 = vld [vmem:[%s3620_s6 + $0x198] sm:$0xff] }
 0x380   : > { %2311 = vmatprep.subr.bf16.mxu0 %v2310_v28  ;;  %v1134_v36 = vmul.f32 %v1127_v26, %v1121_v30  ;;  %v1135_v41 = vmul.f32 %v1131_v29, %v1118_v32  ;;  %v2048_v26 = vld [vmem:[%s3620_s6 + $0x190] sm:$0xff]  ;;  %v2358_v28 = vpack.c.bf16 %v2047_v9, %v2046_v22  ;;  %v2018_v30 = vld [vmem:[%s3654_s2 + $0x8] sm:$0xff]  ;;  %v2078_v9 = vld [vmem:[%s3620_s6 + $0x280] sm:$0xff] }
 0x381   : > { %2313 = vmatpush1.bf16.msra.mxu0 %v2312_v24  ;;  %v2362_v32 = vpack.c.bf16 %v2049_v27, %v2048_v26 }
 0x382   : > { %v1182_v38 = vpop.permute.xlu0 %1181  ;;  %v1139_v39 = vpop.permute.xlu1 %1138 }
 0x383   : > { %v1187_v42 = vsel %vm511_vm4, %v1182_v38, %v1180_v60  ;;  %v1143_v43 = vsel %vm468_vm3, %v1142_v25, %v1139_v39  ;;  %v1146_v2 = vsel %vm468_vm3, %v1139_v39, %v1142_v25  ;;  %v1183_v46 = vsel %vm511_vm4, %v1180_v60, %v1182_v38  ;;  %v2030_v25 = vld [vmem:[%s3620_s6 + $0x100] sm:$0xff] }
 0x384   : > { %v1201_v47 = vmul.f32 %v1197_v33, %v1187_v42  ;;  %v1159_v48 = vmul.f32 %v1152_v34, %v1146_v2  ;;  %v1160_v49 = vmul.f32 %v1156_v35, %v1143_v43  ;;  %v1200_v57 = vmul.f32 %v1193_v37, %v1183_v46  ;;  %v2032_v33 = vld [vmem:[%s3620_s6 + $0x110] sm:$0xff]  ;;  %v2033_v34 = vld [vmem:[%s3620_s6 + $0x118] sm:$0xff]  ;;  %v2050_v35 = vld [vmem:[%s3620_s6 + $0x1a0] sm:$0xff] }
 0x385   : > { %v1243_v60 = vrot.slane %v2027_v52, %v2808_v8  ;;  %v2031_v8 = vld [vmem:[%s3620_s6 + $0x108] sm:$0xff]  ;;  %v2364_v37 = vpack.c.bf16 %v2033_v34, %v2032_v33  ;;  %v2034_v39 = vld [vmem:[%s3620_s6 + $0x120] sm:$0xff]  ;;  %v2053_v42 = vld [vmem:[%s3620_s6 + $0x1b8] sm:$0xff] }
 0x386   : > { %v2316_v45 = vpack.c.bf16 %v1159_v48, %v1134_v36  ;;  %v1207_v53 = vpop.permute.xlu0 %1206  ;;  %v1205_v54 = vpop.permute.xlu1 %1204  ;;  %v2314_v55 = vpack.c.bf16 %v1160_v49, %v1135_v41  ;;  %v2318_v62 = vpack.c.bf16 %v1201_v47, %v1176_v56  ;;  %v2320_v0 = vpack.c.bf16 %v1200_v57, %v1175_v4  ;;  %v2051_v36 = vld [vmem:[%s3620_s6 + $0x1a8] sm:$0xff]  ;;  %v2052_v41 = vld [vmem:[%s3620_s6 + $0x1b0] sm:$0xff]  ;;  %v2037_v47 = vld [vmem:[%s3620_s6 + $0x138] sm:$0xff] }
 0x387   : > { %v1208_v5 = vsel %vm538_vm5, %v1205_v54, %v1207_v53  ;;  %v1212_v21 = vsel %vm538_vm5, %v1207_v53, %v1205_v54  ;;  %v2360_v31 = vpack.c.bf16 %v2031_v8, %v2030_v25  ;;  %v2366_v38 = vpack.c.bf16 %v2051_v36, %v2050_v35  ;;  %v2036_v46 = vld [vmem:[%s3620_s6 + $0x130] sm:$0xff]  ;;  %v2054_v48 = vld [vmem:[%s3620_s6 + $0x1c0] sm:$0xff]  ;;  %v2055_v49 = vld [vmem:[%s3620_s6 + $0x1c8] sm:$0xff] }
 0x388   : > { %2315 = vmatprep.subr.bf16.mxu0 %v2314_v55  ;;  %v1225_v11 = vmul.f32 %v1218_v58, %v1208_v5  ;;  %v1226_v12 = vmul.f32 %v1222_v59, %v1212_v21  ;;  %v2368_v43 = vpack.c.bf16 %v2035_v40, %v2034_v39  ;;  %v2370_v2 = vpack.c.bf16 %v2053_v42, %v2052_v41  ;;  %v2038_v52 = vld [vmem:[%s3620_s6 + $0x140] sm:$0xff]  ;;  %v2056_v53 = vld [vmem:[%s3620_s6 + $0x1d0] sm:$0xff]  ;;  %v2057_v54 = vld [vmem:[%s3620_s6 + $0x1d8] sm:$0xff] }
 0x389   : > { %2317 = vmatpush1.bf16.msra.mxu0 %v2316_v45  ;;  %v2372_v50 = vpack.c.bf16 %v2037_v47, %v2036_v46  ;;  %v2374_v51 = vpack.c.bf16 %v2055_v49, %v2054_v48  ;;  %v2039_v45 = vld [vmem:[%s3620_s6 + $0x148] sm:$0xff]  ;;  %v2378_v56 = vpack.c.bf16 %v2057_v54, %v2056_v53  ;;  %v2040_v57 = vld [vmem:[%s3620_s6 + $0x150] sm:$0xff]  ;;  %v2041_v58 = vld [vmem:[%s3620_s6 + $0x158] sm:$0xff] }
 0x38a   : > { %v1232_v6 = vpop.permute.xlu0 %1231  ;;  %v1230_v44 = vpop.permute.xlu1 %1229  ;;  %2319 = vmatprep.subr.bf16.mxu0 %v2318_v62  ;;  %v2376_v55 = vpack.c.bf16 %v2039_v45, %v2038_v52  ;;  %v2380_v59 = vpack.c.bf16 %v2041_v58, %v2040_v57  ;;  %v2058_v62 = vld [vmem:[%s3620_s6 + $0x1e0] sm:$0xff]  ;;  %v2059_v4 = vld [vmem:[%s3620_s6 + $0x1e8] sm:$0xff]  ;;  %v2080_v39 = vld [vmem:[%s3620_s6 + $0x290] sm:$0xff] }
 0x38b   : > { %v1233_v1 = vsel %vm565_vm6, %v1230_v44, %v1232_v6  ;;  %v1237_v7 = vsel %vm565_vm6, %v1232_v6, %v1230_v44  ;;  %v1401_v5 = vld [vmem:[%s3620_s6 + $0x60] sm:$0xff]  ;;  %v1402_v21 = vld [vmem:[%s3620_s6 + $0x68] sm:$0xff]  ;;  %v2382_v6 = vpack.c.bf16 %v2059_v4, %v2058_v62  ;;  %v2081_v41 = vld [vmem:[%s3620_s6 + $0x298] sm:$0xff] }
 0x38c   : > { %v1250_v13 = vmul.f32 %v1243_v60, %v1233_v1  ;;  %v1251_v14 = vmul.f32 %v1247_v61, %v1237_v7  ;;  %v1417_v60 = vld [vmem:[%s3620_s6 + $0xe0] sm:$0xff]  ;;  %v1418_v61 = vld [vmem:[%s3620_s6 + $0xe8] sm:$0xff]  ;;  %v2352_v44 = vpack.c.bf16 %v1402_v21, %v1401_v5  ;;  %v2112_v42 = vld [vmem:[%s3620_s6 + $0x390] sm:$0xff]  ;;  %v2394_v45 = vpack.c.bf16 %v2081_v41, %v2080_v39 }
 0x38d   : > { %2321 = vmatpush1.bf16.msra.mxu0 %v2320_v0  ;;  %v2350_v63 = vpack.c.bf16 %v1418_v61, %v1417_v60  ;;  %v2042_v0 = vld [vmem:[%s3620_s6 + $0x160] sm:$0xff]  ;;  %v2043_v1 = vld [vmem:[%s3620_s6 + $0x168] sm:$0xff]  ;;  %v2064_v48 = vld [vmem:[%s3620_s6 + $0x210] sm:$0xff] }
 0x38e   : > { %v2324_v19 = vpack.c.bf16 %v1250_v13, %v1225_v11  ;;  %v1257_v15 = vpop.permute.xlu0 %1256  ;;  %v1255_v16 = vpop.permute.xlu1 %1254  ;;  %v2322_v17 = vpack.c.bf16 %v1251_v14, %v1226_v12  ;;  %v2384_v7 = vpack.c.bf16 %v2043_v1, %v2042_v0  ;;  %v1420_v11 = vld [vmem:[%s3620_s6 + $0xf8] sm:$0xff]  ;;  %v2060_v12 = vld [vmem:[%s3620_s6 + $0x1f0] sm:$0xff]  ;;  %v2111_v8 = vld [vmem:[%s3620_s6 + $0x388] sm:$0xff] }
 0x38f   : > { %v1262_v20 = vsel %vm592_vm7, %v1257_v15, %v1255_v16  ;;  %v1258_v23 = vsel %vm592_vm7, %v1255_v16, %v1257_v15  ;;  %2351 = vmatprep.subr.bf16.mxu1 %v2350_v63  ;;  %v2061_v14 = vld [vmem:[%s3620_s6 + $0x1f8] sm:$0xff]  ;;  %v2062_v33 = vld [vmem:[%s3620_s6 + $0x200] sm:$0xff]  ;;  %v2063_v35 = vld [vmem:[%s3620_s6 + $0x208] sm:$0xff] }
 0x390   : > { %v1276_v24 = vmul.f32 %v1272_v10, %v1262_v20  ;;  %2323 = vmatprep.subr.bf16.mxu0 %v2322_v17  ;;  %v1275_v29 = vmul.f32 %v1268_v18, %v1258_v23  ;;  %2353 = vmatpush3.bf16.msra.mxu1 %v2352_v44  ;;  %v1419_v10 = vld [vmem:[%s3620_s6 + $0xf0] sm:$0xff]  ;;  %v1404_v15 = vld [vmem:[%s3620_s6 + $0x78] sm:$0xff]  ;;  %v2386_v16 = vpack.c.bf16 %v2061_v14, %v2060_v12  ;;  %v2079_v23 = vld [vmem:[%s3620_s6 + $0x288] sm:$0xff] }
 0x391   : > { %2325 = vmatpush1.bf16.msra.mxu0 %v2324_v19  ;;  %v2354_v13 = vpack.c.bf16 %v1420_v11, %v1419_v10  ;;  %v1403_v19 = vld [vmem:[%s3620_s6 + $0x70] sm:$0xff]  ;;  %v2045_v20 = vld [vmem:[%s3620_s6 + $0x178] sm:$0xff]  ;;  %v2390_v25 = vpack.c.bf16 %v2079_v23, %v2078_v9  ;;  %v2094_v36 = vld [vmem:[%s3620_s6 + $0x300] sm:$0xff]  ;;  %v2392_v46 = vpack.c.bf16 %v2063_v35, %v2062_v33 }
 0x392   : > { %1316 = vmatprep.subr.mxu0 %v1276_v24  ;;  %v2356_v17 = vpack.c.bf16 %v1404_v15, %v1403_v19  ;;  %v2044_v18 = vld [vmem:[%s3620_s6 + $0x170] sm:$0xff]  ;;  %v2110_v24 = vld [vmem:[%s3620_s6 + $0x380] sm:$0xff]  ;;  %v2065_v49 = vld [vmem:[%s3620_s6 + $0x218] sm:$0xff] }
 0x393   : > { %2355 = vmatprep.subr.bf16.mxu1 %v2354_v13  ;;  %v2388_v22 = vpack.c.bf16 %v2045_v20, %v2044_v18  ;;  %v2422_v26 = vpack.c.bf16 %v2111_v8, %v2110_v24  ;;  %v2082_v52 = vld [vmem:[%s3620_s6 + $0x2a0] sm:$0xff]  ;;  %v2083_v54 = vld [vmem:[%s3620_s6 + $0x2a8] sm:$0xff]  ;;  %v2396_v57 = vpack.c.bf16 %v2065_v49, %v2064_v48  ;;  %v2084_v5 = vld [vmem:[%s3620_s6 + $0x2b0] sm:$0xff] }
 0x394   : > { %2357 = vmatpush3.bf16.msra.mxu1 %v2356_v17  ;;  %v2067_v60 = vld [vmem:[%s3620_s6 + $0x228] sm:$0xff]  ;;  %v2398_v61 = vpack.c.bf16 %v2083_v54, %v2082_v52  ;;  %v2098_v63 = vld [vmem:[%s3620_s6 + $0x320] sm:$0xff]  ;;  %v2085_v21 = vld [vmem:[%s3620_s6 + $0x2b8] sm:$0xff] }
 0x395   : > { %1317 = vmatpush1.msra.mxu0 %v1275_v29  ;;  %2391 = vmatprep.subr.bf16.mxu1 %v2390_v25  ;;  %v2099_v4 = vld [vmem:[%s3620_s6 + $0x328] sm:$0xff]  ;;  %v2117_v44 = vld [vmem:[%s3620_s6 + $0x3b8] sm:$0xff]  ;;  %v2402_v11 = vpack.c.bf16 %v2085_v21, %v2084_v5  ;;  %v2100_v13 = vld [vmem:[%s3620_s6 + $0x330] sm:$0xff] }
 0x396   : > { %2029 = vmatmul.mubr.msk.f32.vlgmr.msra.gmra.mrb[2].mxu0 %vm633_vm8, %v2018_v30  ;;  %2359 = vmatprep.subr.bf16.mxu0 %v2358_v28  ;;  %v2432_v1 = vpack.c.bf16 %v2099_v4, %v2098_v63  ;;  %v2069_v10 = vld [vmem:[%s3620_s6 + $0x238] sm:$0xff]  ;;  %v2086_v19 = vld [vmem:[%s3620_s6 + $0x2c0] sm:$0xff]  ;;  %v2087_v15 = vld [vmem:[%s3620_s6 + $0x2c8] sm:$0xff] }
 0x397   : > { %2361 = vmatpush3.bf16.msra.mxu0 %v2360_v31  ;;  %v2101_v14 = vld [vmem:[%s3620_s6 + $0x338] sm:$0xff]  ;;  %v2119_v17 = vld [vmem:[%s3620_s6 + $0x3c8] sm:$0xff]  ;;  %v2406_v23 = vpack.c.bf16 %v2087_v15, %v2086_v19  ;;  %v2102_v25 = vld [vmem:[%s3620_s6 + $0x340] sm:$0xff] }
 0x398   : > { %2363 = vmatprep.subr.bf16.mxu0 %v2362_v32  ;;  %v2436_v20 = vpack.c.bf16 %v2101_v14, %v2100_v13  ;;  %v2071_v9 = vld [vmem:[%s3620_s6 + $0x248] sm:$0xff]  ;;  %v2073_v33 = vld [vmem:[%s3620_s6 + $0x258] sm:$0xff]  ;;  %v2122_v41 = vld [vmem:[%s3620_s6 + $0x3e0] sm:$0xff] }
 0x399   : > { %v2103_v8 = vld [vmem:[%s3620_s6 + $0x348] sm:$0xff]  ;;  %v2092_v52 = vld [vmem:[%s3620_s6 + $0x2f0] sm:$0xff]  ;;  %v2125_v54 = vld [vmem:[%s3620_s6 + $0x3f8] sm:$0xff] }
 0x39a   : > { %v2091_v39 = vld [vmem:[%s3620_s6 + $0x2e8] sm:$0xff] }
 0x39b   : > { %2365 = vmatpush3.bf16.msra.mxu0 %v2364_v37  ;;  %v2095_v37 = vld [vmem:[%s3620_s6 + $0x308] sm:$0xff] }
 0x39c   : > { %2367 = vmatprep.subr.bf16.mxu0 %v2366_v38  ;;  %v2424_v47 = vpack.c.bf16 %v2095_v37, %v2094_v36  ;;  %v2104_v36 = vld [vmem:[%s3620_s6 + $0x350] sm:$0xff]  ;;  %v2105_v37 = vld [vmem:[%s3620_s6 + $0x358] sm:$0xff] }
 0x39f   : > { %2369 = vmatpush3.bf16.msra.mxu0 %v2368_v43  ;;  %v1374_v27 = vpop.permute.xlu1 %1373  ;;  %v1381_v31 = vpop.permute.xlu0 %1380  ;;  %v2113_v43 = vld [vmem:[%s3620_s6 + $0x398] sm:$0xff] }
 0x3a0   : > { %2371 = vmatprep.subr.bf16.mxu0 %v2370_v2  ;;  %v2426_v53 = vpack.c.bf16 %v2113_v43, %v2112_v42  ;;  %v2123_v42 = vld [vmem:[%s3620_s6 + $0x3e8] sm:$0xff] }
 0x3a1   : > { %v2446_v49 = vpack.c.bf16 %v2123_v42, %v2122_v41 }
 0x3a3   : > { %2373 = vmatpush3.bf16.msra.mxu0 %v2372_v50  ;;  %v2096_v50 = vld [vmem:[%s3620_s6 + $0x310] sm:$0xff] }
 0x3a4   : > { %2375 = vmatprep.subr.bf16.mxu0 %v2374_v51  ;;  %v2097_v51 = vld [vmem:[%s3620_s6 + $0x318] sm:$0xff] }
 0x3a5   : > { %v2428_v58 = vpack.c.bf16 %v2097_v51, %v2096_v50  ;;  %v2106_v50 = vld [vmem:[%s3620_s6 + $0x360] sm:$0xff]  ;;  %v2107_v51 = vld [vmem:[%s3620_s6 + $0x368] sm:$0xff] }
 0x3a7   : > { %2377 = vmatpush3.bf16.msra.mxu0 %v2376_v55  ;;  %v2114_v55 = vld [vmem:[%s3620_s6 + $0x3a0] sm:$0xff] }
 0x3a8   : > { %2379 = vmatprep.subr.bf16.mxu0 %v2378_v56  ;;  %v2115_v56 = vld [vmem:[%s3620_s6 + $0x3a8] sm:$0xff] }
 0x3a9   : > { %v2430_v62 = vpack.c.bf16 %v2115_v56, %v2114_v55  ;;  %v2448_v56 = vpack.c.bf16 %v2107_v51, %v2106_v50 }
 0x3ab   : > { %2381 = vmatpush3.bf16.msra.mxu0 %v2380_v59  ;;  %v2066_v59 = vld [vmem:[%s3620_s6 + $0x220] sm:$0xff] }
 0x3ac   : > { %2383 = vmatprep.subr.bf16.mxu0 %v2382_v6  ;;  %v2116_v6 = vld [vmem:[%s3620_s6 + $0x3b0] sm:$0xff]  ;;  %v2400_v0 = vpack.c.bf16 %v2067_v60, %v2066_v59  ;;  %v2077_v60 = vld [vmem:[%s3620_s6 + $0x278] sm:$0xff] }
 0x3ad   : > { %v2434_v12 = vpack.c.bf16 %v2117_v44, %v2116_v6 }
 0x3af   : > { %2385 = vmatpush3.bf16.msra.mxu0 %v2384_v7  ;;  %v2068_v7 = vld [vmem:[%s3620_s6 + $0x230] sm:$0xff] }
 0x3b0   : > { %2387 = vmatprep.subr.bf16.mxu0 %v2386_v16  ;;  %v2118_v16 = vld [vmem:[%s3620_s6 + $0x3c0] sm:$0xff]  ;;  %v2404_v18 = vpack.c.bf16 %v2069_v10, %v2068_v7 }
 0x3b1   : > { %v2438_v24 = vpack.c.bf16 %v2119_v17, %v2118_v16 }
 0x3b3   : > { %2389 = vmatpush3.bf16.msra.mxu0 %v2388_v22  ;;  %v2070_v22 = vld [vmem:[%s3620_s6 + $0x240] sm:$0xff] }
 0x3b4   : > { %2423 = vmatprep.subr.bf16.mxu0 %v2422_v26  ;;  %v2088_v26 = vld [vmem:[%s3620_s6 + $0x2d0] sm:$0xff] }
 0x469   : > { %v1366_v28 = vpop.f32.mrb[2].mxu0 }
 0x46a   : > { %v1376_v29 = vmul.f32 %v1374_v27, %v1366_v28  ;;  %v1368_v30 = vpop.f32.mrb[3].mxu0  ;;  %v2120_v28 = vld [vmem:[%s3620_s6 + $0x3d0] sm:$0xff] }
 0x46b   : > { %v1377_v32 = vmul.f32 %v1374_v27, %v1368_v30  ;;  %v2089_v27 = vld [vmem:[%s3620_s6 + $0x2d8] sm:$0xff]  ;;  %v2408_v30 = vpack.c.bf16 %v2071_v9, %v2070_v22 }
 0x46c   : > { %v1383_v34 = vadd.f32 %v1381_v31, %v1376_v29  ;;  %v2121_v29 = vld [vmem:[%s3620_s6 + $0x3d8] sm:$0xff] }
 0x46d   : > { %v1384_v38 = vadd.f32 %v1381_v31, %v1377_v32  ;;  %v2440_v31 = vpack.c.bf16 %v2103_v8, %v2102_v25  ;;  %v2072_v32 = vld [vmem:[%s3620_s6 + $0x250] sm:$0xff]  ;;  %v2442_v35 = vpack.c.bf16 %v2121_v29, %v2120_v28 }
 0x46e   : > { %v3321_v40 = vmax.f32 %v1383_v34, 0.0  ;;  %v2410_v34 = vpack.c.bf16 %v2089_v27, %v2088_v26  ;;  %v2412_v43 = vpack.c.bf16 %v2073_v33, %v2072_v32 }
 0x46f   : > { %v1386_v2 = vmax.f32 %v1384_v38, 0.0  ;;  %v2090_v38 = vld [vmem:[%s3620_s6 + $0x2e0] sm:$0xff] }
 0x470   : > { %1387 = vst [vmem:[%s3347_s0] sm:$0xff] %v3321_v40  ;;  %v2414_v48 = vpack.c.bf16 %v2091_v39, %v2090_v38 }
 0x471   : > { %1485 = vmatprep.mubr.f32.mxu1 %v1386_v2  ;;  %1588 = vmatprep.mubr.f32.mxu0 %v1386_v2  ;;  %1388 = vst [vmem:[%s3347_s0 + $0x8] sm:$0xff] %v1386_v2 }
 0x472   : > { %1486 = vmatmul.mubr.f32.vlgmr.msra.gmra.mrb[2].mxu1 %v3321_v40  ;;  %1589 = vmatmul.mubr.f32.vlgmr.msra.gmra.mrb[4].mxu0 %v3321_v40 }
 0x473   : > { %2393 = vmatpush3.bf16.msra.mxu1 %v2392_v46  ;;  %2425 = vmatpush3.bf16.msra.mxu0 %v2424_v47  ;;  %v2074_v46 = vld [vmem:[%s3620_s6 + $0x260] sm:$0xff]  ;;  %v2075_v47 = vld [vmem:[%s3620_s6 + $0x268] sm:$0xff] }
 0x474   : > { %1691 = vmatprep.mubr.f32.mxu1 %v1386_v2  ;;  %1794 = vmatprep.mubr.f32.mxu0 %v1386_v2  ;;  %v2444_v2 = vpack.c.bf16 %v2105_v37, %v2104_v36  ;;  %v2416_v55 = vpack.c.bf16 %v2075_v47, %v2074_v46 }
 0x475   : > { %2395 = vmatprep.subr.bf16.mxu1 %v2394_v45  ;;  %2427 = vmatprep.subr.bf16.mxu0 %v2426_v53  ;;  %v2093_v45 = vld [vmem:[%s3620_s6 + $0x2f8] sm:$0xff]  ;;  %v2124_v53 = vld [vmem:[%s3620_s6 + $0x3f0] sm:$0xff] }
 0x476   : > { %v2450_v59 = vpack.c.bf16 %v2125_v54, %v2124_v53 }
 0x477   : > { %2397 = vmatpush3.bf16.msra.mxu1 %v2396_v57  ;;  %2429 = vmatpush3.bf16.msra.mxu0 %v2428_v58  ;;  %v2076_v57 = vld [vmem:[%s3620_s6 + $0x270] sm:$0xff]  ;;  %v2418_v58 = vpack.c.bf16 %v2093_v45, %v2092_v52 }
 0x478   : > { %2399 = vmatprep.subr.bf16.mxu1 %v2398_v61  ;;  %2431 = vmatprep.subr.bf16.mxu0 %v2430_v62  ;;  %v2108_v61 = vld [vmem:[%s3620_s6 + $0x370] sm:$0xff]  ;;  %v2109_v62 = vld [vmem:[%s3620_s6 + $0x378] sm:$0xff]  ;;  %v2420_v63 = vpack.c.bf16 %v2077_v60, %v2076_v57 }
 0x479   : > { %v2452_v4 = vpack.c.bf16 %v2109_v62, %v2108_v61 }
 0x47b   : > { %2401 = vmatpush3.bf16.msra.mxu1 %v2400_v0  ;;  %2433 = vmatpush3.bf16.msra.mxu0 %v2432_v1 }
 0x47c   : > { %2403 = vmatprep.subr.bf16.mxu1 %v2402_v11  ;;  %2435 = vmatprep.subr.bf16.mxu0 %v2434_v12 }
 0x47f   : > { %2405 = vmatpush3.bf16.msra.mxu1 %v2404_v18  ;;  %2437 = vmatpush3.bf16.msra.mxu0 %v2436_v20 }
 0x480   : > { %2407 = vmatprep.subr.bf16.mxu1 %v2406_v23  ;;  %2439 = vmatprep.subr.bf16.mxu0 %v2438_v24 }
 0x483   : > { %2409 = vmatpush3.bf16.msra.mxu1 %v2408_v30  ;;  %2441 = vmatpush3.bf16.msra.mxu0 %v2440_v31 }
 0x484   : > { %2411 = vmatprep.subr.bf16.mxu1 %v2410_v34  ;;  %2443 = vmatprep.subr.bf16.mxu0 %v2442_v35 }
 0x487   : > { %2413 = vmatpush3.bf16.msra.mxu1 %v2412_v43  ;;  %2445 = vmatpush3.bf16.msra.mxu0 %v2444_v2 }
 0x488   : > { %2415 = vmatprep.subr.bf16.mxu1 %v2414_v48  ;;  %2447 = vmatprep.subr.bf16.mxu0 %v2446_v49 }
 0x48b   : > { %2417 = vmatpush3.bf16.msra.mxu1 %v2416_v55  ;;  %2449 = vmatpush3.bf16.msra.mxu0 %v2448_v56 }
 0x48c   : > { %2419 = vmatprep.subr.bf16.mxu1 %v2418_v58  ;;  %2451 = vmatprep.subr.bf16.mxu0 %v2450_v59 }
 0x48f   : > { %2421 = vmatpush3.bf16.msra.mxu1 %v2420_v63  ;;  %2453 = vmatpush3.bf16.msra.mxu0 %v2452_v4 }
 0x492   : > { %1692 = vmatmul.mubr.f32.vlgmr.msra.gmra.mrb[4].mxu1 %v3321_v40  ;;  %1795 = vmatmul.mubr.f32.vlgmr.msra.gmra.mrb[6].mxu0 %v3321_v40 }
 0x493   : > { %2528 = shalt.err (!%p2525_p3)
}
 0x494   : > { %s2529_s0 = scalar_lea.hbm %s3501_s12, 256  ;;  %s2533_s1 = scalar_lea.hbm %s3622_s8, 512 }
 0x495   : > { %p2530_p4 = scmp.ne.s32.totalorder %s3501_s12, %s2529_s0  ;;  %p2534_p9 = scmp.lt.u32.totalorder %s3501_s12, %s3622_s8 }
 0x496   : > { %p2535_p10 = scmp.lt.u32.totalorder %s2533_s1, %s2529_s0  ;;  %p2537_p12 = scmp.lt.u32.totalorder %s2529_s0, %s3501_s12 }
 0x497   : > { %p2531_p7 = pnand %p2530_p4, %p2747_p5 }
 0x498   : > { %p2536_p11 = por %p2535_p10, %p2534_p9 }
 0x499   : > { %p2532_p8 = pneg %p2531_p7 }
 0x49a   : > { %p2538_p13 = por %p2537_p12, %p2536_p11 }
 0x49c   : > { %p2539_p0 = pnand %p2538_p13, %p2532_p8 }
 0x49e   : > { %2542 = shalt.err (!%p2539_p0)
}
 0x49f   : > { %2454 = dma.vmem_to_hbm [thread:$0]  (%p2747_p5), %s1844_s11, 256, %s3501_s12, %s1819_s21   ;;  %v2126_v17 = vld [vmem:[%s3621_s7] ss:$0 sm:$0xff]  ;;  %vm1809_vm11 = vcmask 523264  }
 0x4a0   : > { %s1994_s27 = sshll.u32 %s3303_s20, 3  ;;  %s1823_s28 = sand.u32 1, %s2728_s17  }
 0x4a1   : > { %s2132_s25 = sshll.u32 %s2728_s17, 7  ;;  %s363_s12 = scalar_lea.vmem [#allocation5], %s1994_s27 }
 0x4a2   : > { %s1856_s11 = sshll.u32 %s363_s12, 4  ;;  %s3529_s20 = scalar_lea.vmem [#allocation7], %s1994_s27  ;;  %s3537_s11 = int_to_ptr.vmem [resolvable:$true] %s1856_s11 }
 0x4a3   : > { %s1869_s0 = sshll.u32 %s3529_s20, 4  ;;  %s3535_s29 = scalar_lea.hbm %s3623_s9, %s2132_s25  ;;  %s3545_s0 = int_to_ptr.vmem [resolvable:$true] %s1869_s0 }
 0x4a4   : > { %s3543_s18 = scalar_lea.hbm %s3624_s10, %s2132_s25  ;;  %s3547_s27 = scalar_lea.sflag [#allocation6], %s1823_s28 }
 0x4a5   : > { %s2543_s21 = scalar_lea.vmem %s3537_s11, 128  ;;  %s2650_s26 = smov [#allocation5]  }
 0x4a6   : > { %p2544_p1 = scmp.ne.s32.totalorder %s3537_s11, %s2543_s21  ;;  %s2547_s2 = sshll.u32 %s2650_s26, 4  ;;  %s2548_s2 = int_to_ptr.vmem [resolvable:$false] %s2547_s2 }
 0x4a7   : > { %s2549_s17 = scalar_lea.vmem %s2548_s2, 256  ;;  %p2550_p4 = scmp.lt.s32.totalorder %s3537_s11, %s2548_s2 }
 0x4a8   : > { %p2545_p2 = pnand %p2544_p1, %p2747_p5  ;;  %p2551_p7 = scmp.lt.s32.totalorder %s2549_s17, %s2543_s21 }
 0x4aa   : > { %p2546_p3 = pneg %p2545_p2  ;;  %p2552_p8 = por %p2551_p7, %p2550_p4 }
 0x4ac   : > { %p2553_p9 = pnand %p2552_p8, %p2546_p3 }
 0x545   : > { %v2170_v40 = vpop.f32.mrb[2].mxu1  ;;  %v2205_v5 = vpop.f32.mrb[4].mxu0 }
 0x546   : > { %v2171_v21 = vpop.f32.mrb[3].mxu1  ;;  %v2206_v6 = vpop.f32.mrb[5].mxu0 }
 0x547   : > { %v2172_v44 = vadd.f32 %v2171_v21, %v2170_v40  ;;  %v2207_v0 = vadd.f32 %v2206_v6, %v2205_v5 }
 0x549   : > { %vm1800_vm9 = vcmp.gt.f32.partialorder %v2207_v0, %v2172_v44 }
 0x54a   : > { %v1801_v1 = vsel %vm1800_vm9, %v2207_v0, %v2172_v44  ;;  %v1802_v19 = vsel %vm1800_vm9, 1, %v2646_v3 }
 0x565   : > { %v2240_v7 = vpop.f32.mrb[4].mxu1  ;;  %v2275_v10 = vpop.f32.mrb[6].mxu0 }
 0x566   : > { %v2241_v11 = vpop.f32.mrb[5].mxu1  ;;  %v2276_v12 = vpop.f32.mrb[7].mxu0 }
 0x567   : > { %v2242_v13 = vadd.f32 %v2241_v11, %v2240_v7  ;;  %v2277_v14 = vadd.f32 %v2276_v12, %v2275_v10 }
 0x569   : > { %vm1803_vm10 = vcmp.gt.f32.partialorder %v2242_v13, %v1801_v1 }
 0x56a   : > { %v1805_v15 = vsel %vm1803_vm10, 16, %v1802_v19  ;;  %v1804_v16 = vsel %vm1803_vm10, %v2242_v13, %v1801_v1 }
 0x56b   : > { %vm1806_vm12 = vcmp.gt.f32.partialorder %v2277_v14, %v1804_v16 }
 0x56c   : > { %v1807_v3 = vsel %vm1806_vm12, %v2277_v14, %v1804_v16  ;;  %v1808_v18 = vsel %vm1806_vm12, 17, %v1805_v15 }
 0x56d   : > { %v1816_v20 = vadd.s32 %v2126_v17, %v1808_v18  ;;  %1810 = vst.msk [vmem:[%s363_s12] sm:$0xff] %vm1809_vm11, %v1807_v3 }
 0x56e   : > { %2556 = shalt.err (!%p2553_p9)
}
 0x56f   : > { %s2557_s28 = scalar_lea.hbm %s3535_s29, 128  ;;  %s2561_s1 = scalar_lea.hbm %s3623_s9, 256 }
 0x570   : > { %p2558_p10 = scmp.ne.s32.totalorder %s3535_s29, %s2557_s28  ;;  %p2562_p13 = scmp.lt.u32.totalorder %s3535_s29, %s3623_s9 }
 0x571   : > { %p2563_p0 = scmp.lt.u32.totalorder %s2561_s1, %s2557_s28  ;;  %p2565_p2 = scmp.lt.u32.totalorder %s2557_s28, %s3535_s29 }
 0x572   : > { %p2559_p11 = pnand %p2558_p10, %p2747_p5 }
 0x573   : > { %p2564_p1 = por %p2563_p0, %p2562_p13 }
 0x574   : > { %p2560_p12 = pneg %p2559_p11 }
 0x575   : > { %p2566_p3 = por %p2565_p2, %p2564_p1 }
 0x577   : > { %p2567_p4 = pnand %p2566_p3, %p2560_p12 }
 0x579   : > { %2570 = shalt.err (!%p2567_p4)
}
 0x57a   : > { %2455 = dma.vmem_to_hbm [thread:$0]  (%p2747_p5), %s3537_s11, 128, %s3535_s29, %s3547_s27   ;;  %1817 = vst.msk [vmem:[%s3529_s20] sm:$0xff] %vm1809_vm11, %v1816_v20 }
 0x57b   : > { %s2571_s21 = scalar_lea.vmem %s3545_s0, 128  ;;  %s2651_s2 = smov [#allocation7]  }
 0x57c   : > { %p2572_p7 = scmp.ne.s32.totalorder %s3545_s0, %s2571_s21  ;;  %s2575_s17 = sshll.u32 %s2651_s2, 4  ;;  %s2576_s17 = int_to_ptr.vmem [resolvable:$false] %s2575_s17 }
 0x57d   : > { %s2577_s28 = scalar_lea.vmem %s2576_s17, 256  ;;  %p2578_p10 = scmp.lt.s32.totalorder %s3545_s0, %s2576_s17 }
 0x57e   : > { %p2573_p8 = pnand %p2572_p7, %p2747_p5  ;;  %p2579_p11 = scmp.lt.s32.totalorder %s2577_s28, %s2571_s21 }
 0x580   : > { %p2574_p9 = pneg %p2573_p8  ;;  %p2580_p12 = por %p2579_p11, %p2578_p10 }
 0x582   : > { %p2581_p13 = pnand %p2580_p12, %p2574_p9 }
 0x584   : > { %2584 = shalt.err (!%p2581_p13)
}
 0x585   : > { %s2585_s11 = scalar_lea.hbm %s3543_s18, 128  ;;  %s2589_s25 = scalar_lea.hbm %s3624_s10, 256 }
 0x586   : > { %p2586_p0 = scmp.ne.s32.totalorder %s3543_s18, %s2585_s11  ;;  %p2590_p3 = scmp.lt.u32.totalorder %s3543_s18, %s3624_s10 }
 0x587   : > { %p2591_p4 = scmp.lt.u32.totalorder %s2589_s25, %s2585_s11  ;;  %p2593_p8 = scmp.lt.u32.totalorder %s2585_s11, %s3543_s18 }
 0x588   : > { %p2587_p1 = pnand %p2586_p0, %p2747_p5 }
 0x589   : > { %p2592_p7 = por %p2591_p4, %p2590_p3 }
 0x58a   : > { %p2588_p2 = pneg %p2587_p1 }
 0x58b   : > { %p2594_p9 = por %p2593_p8, %p2592_p7 }
 0x58d   : > { %p2595_p10 = pnand %p2594_p9, %p2588_p2 }
 0x58f   : > { %2598 = shalt.err (!%p2595_p10)
}
 0x590   : > { %2456 = dma.vmem_to_hbm [thread:$0]  (%p2747_p5), %s3545_s0, 128, %s3543_s18, %s3547_s27  }
 0x591 PF: > { %p2470_p11 = scmp.ge.s32.totalorder %s2637_s16, 2  ;;  %s1881_s30 = sand.u32 1, %s2625_s13  }
 0x592   : > { %s1882_s26 = scalar_lea.sflag [#allocation4], %s1881_s30 }
 0x593   : > { %p2461_p12 = pnand %p2470_p11, %p2751_p6 }
 0x595   : > { %2616 = dma.done.wait (!%p2461_p12), %s1882_s26, 256  }
 0x596   : > { %2618 = vsyncadd (!%p2461_p12), %s1882_s26, 4294967040  ;;  %s3658_s21 = sadd.s32 4294967294, %s2637_s16  }
 0x597   : > { %s1890_s2 = sand.u32 1, %s3658_s21  }
 0x598   : > { %s1891_s17 = scalar_lea.sflag [#allocation6], %s1890_s2 }
 0x599   : > { %2620 = dma.done.wait (!%p2461_p12), %s1891_s17, 256  }
 0x59a   : > { %2622 = vsyncadd (!%p2461_p12), %s1891_s17, 4294967040  ;;  %p24_p5 = scmp.ge.s32.totalorder %s2732_s19, 4   ;;  %s3659_s13 = smov %s2629_s14 }
 0x59b   : > { %s3660_s14 = smov %s2633_s15  ;;  %s3661_s15 = smov %s2745_s22 }
 0x59c   : > { %s3662_s16 = smov %s2732_s19  ;;  %26 = sbr.rel (!%p24_p5) target bundleno = 9 (0x9), region = 135 }
 0x5a3   :  { %1905 = vsyncpa [#allocation4], 1 }
 0x5a4   :  { %1907 = vsyncpa [#allocation4 + $0x1], 1 }
 0x5a5   :  { %1908 = vsyncpa [#allocation6], 1 }
 0x5a6   :  { %1910 = vsyncpa [#allocation6 + $0x1], 1 }

</bundles_post_ra>
